<compile_context>
chip_gen: v7x
topology: tpu7x:2x2x1
jax: 0.10.0
libtpu: 0.0.40
codegen_flags: <defaults>
</compile_context>

<pallas_src>
import functools

import jax
import jax.numpy as jnp
from jax.experimental import pallas as pl
from jax.experimental.pallas import tpu as pltpu


# --------------------------------------------------------------------------- chip budget

@functools.lru_cache(maxsize=None)
def _vmem_limit():
    """Generation-aware VMEM budget: ~75% of per-core VMEM, capped at 100 MiB."""
    cap = 64 * 1024 * 1024                      # conservative default (v7x per-TC VMEM)
    try:
        cap = int(pltpu.get_tpu_info().vmem_capacity_bytes)
    except Exception:                           # query/field unavailable -> keep default
        pass
    return max(32 * 1024 * 1024, min(cap * 3 // 4, 100 * 1024 * 1024))


def _tile_rows(dim, target):
    """Row (sublane) tile: largest multiple of 8 <= target dividing dim. Never > target."""
    if dim <= target:
        return dim
    t = (target // 8) * 8
    while t >= 8:
        if dim % t == 0:
            return t
        t -= 8
    for t in range(min(target, dim), 0, -1):    # bounded fallback (no whole-array blowup)
        if dim % t == 0:
            return t
    return 1


def _tile_lane(dim, target):
    """Lane tile: prefer 256-multiples (full v6e/v7x MXU pass), then 128. Never > target."""
    if dim <= target:
        return dim
    for base in (256, 128):
        t = (target // base) * base
        while t >= base:
            if dim % t == 0:
                return t
            t -= base
    for t in range(min(target, dim), 0, -1):
        if dim % t == 0:
            return t
    return 1


# --------------------------------------------------------------------------- kernels

def _linear(x, w, b, activation=None, out_dtype=None, tm=256, tn=512, tk=512):
    """y = act(x @ w + b). x:(M,K), w:(K,N) bf16, b:(1,N) f32. Tiled, f32 accumulator."""
    M, K = x.shape
    N = w.shape[1]
    out_dtype = out_dtype or x.dtype
    tm = _tile_rows(M, tm)
    tn = _tile_lane(N, tn)
    tk = _tile_lane(K, tk)
    gm, gn, gk = M // tm, N // tn, K // tk

    def kernel(x_ref, w_ref, b_ref, o_ref, acc_ref):
        @pl.when(pl.program_id(2) == 0)
        def _():
            acc_ref[...] = jnp.zeros_like(acc_ref)

        acc_ref[...] += jnp.dot(x_ref[...], w_ref[...],
                                preferred_element_type=jnp.float32)

        @pl.when(pl.program_id(2) == gk - 1)
        def _():
            y = acc_ref[...] + b_ref[...].astype(jnp.float32)
            if activation == "gelu":
                y = jax.nn.gelu(y, approximate=True)     # f32 math (EUP tanh)
            elif activation == "tanh":
                y = jnp.tanh(y)
            o_ref[...] = y.astype(o_ref.dtype)

    # TODO(synk): for long-K / tiny-M matmuls (pooler, doc head) sweep
    #             pipeline_mode=pl.Buffered(3) on the weight BlockSpec.
    return pl.pallas_call(
        kernel,
        out_shape=jax.ShapeDtypeStruct((M, N), out_dtype),
        grid=(gm, gn, gk),
        in_specs=[
            pl.BlockSpec((tm, tk), lambda i, j, k: (i, k)),
            pl.BlockSpec((tk, tn), lambda i, j, k: (k, j)),
            pl.BlockSpec((1, tn), lambda i, j, k: (0, j)),
        ],
        out_specs=pl.BlockSpec((tm, tn), lambda i, j, k: (i, j)),
        scratch_shapes=[pltpu.VMEM((tm, tn), jnp.float32)],
        compiler_params=pltpu.CompilerParams(
            dimension_semantics=("parallel", "parallel", "arbitrary"),
            vmem_limit_bytes=_vmem_limit()),
    )(x, w, b)


def _linear_ln(x, w, b, residual, gamma, beta, eps=1e-12, out_dtype=None,
               tm=256, tk=512):
    """Fused: LayerNorm(x @ w + b + residual). N (= hidden) kept whole per block."""
    M, K = x.shape
    N = w.shape[1]
    out_dtype = out_dtype or residual.dtype
    tm = _tile_rows(M, tm)
    tk = _tile_lane(K, tk)
    gm, gk = M // tm, K // tk

    def kernel(x_ref, w_ref, b_ref, r_ref, g_ref, be_ref, o_ref, acc_ref):
        @pl.when(pl.program_id(1) == 0)
        def _():
            acc_ref[...] = jnp.zeros_like(acc_ref)

        acc_ref[...] += jnp.dot(x_ref[...], w_ref[...],
                                preferred_element_type=jnp.float32)

        @pl.when(pl.program_id(1) == gk - 1)
        def _():
            v = (acc_ref[...] + b_ref[...].astype(jnp.float32)
                 + r_ref[...].astype(jnp.float32))
            mean = jnp.mean(v, axis=-1, keepdims=True)
            var = jnp.mean((v - mean) ** 2, axis=-1, keepdims=True)
            inv = jax.lax.rsqrt(var + eps)
            o_ref[...] = ((v - mean) * inv * g_ref[...].astype(jnp.float32)
                          + be_ref[...].astype(jnp.float32)).astype(o_ref.dtype)

    return pl.pallas_call(
        kernel,
        out_shape=jax.ShapeDtypeStruct((M, N), out_dtype),
        grid=(gm, gk),
        in_specs=[
            pl.BlockSpec((tm, tk), lambda i, k: (i, k)),
            pl.BlockSpec((tk, N), lambda i, k: (k, 0)),
            pl.BlockSpec((1, N), lambda i, k: (0, 0)),
            pl.BlockSpec((tm, N), lambda i, k: (i, 0)),
            pl.BlockSpec((1, N), lambda i, k: (0, 0)),
            pl.BlockSpec((1, N), lambda i, k: (0, 0)),
        ],
        out_specs=pl.BlockSpec((tm, N), lambda i, k: (i, 0)),
        scratch_shapes=[pltpu.VMEM((tm, N), jnp.float32)],
        compiler_params=pltpu.CompilerParams(
            dimension_semantics=("parallel", "arbitrary"),
            vmem_limit_bytes=_vmem_limit()),
    )(x, w, b, residual, gamma, beta)


def _ffn_ln(x, wi, bi, wo2, bo2, gamma, beta, eps=1e-12, out_dtype=None,
            tm=256, ti=512):
    """Fully fused BERT FFN: LayerNorm(gelu(x@wi+bi) @ wo2 + bo2 + x).

    The intermediate (M, I) activation never leaves VMEM; the I axis is the "arbitrary"
    grid axis and is contracted tile-by-tile into an f32 (tm, H) accumulator.
    """
    M, H = x.shape
    I = wi.shape[1]
    out_dtype = out_dtype or x.dtype
    tm = _tile_rows(M, tm)
    ti = _tile_lane(I, ti)
    gm, gi = M // tm, I // ti

    def kernel(x_ref, wi_ref, bi_ref, wo2_ref, bo2_ref, g_ref, be_ref, o_ref, acc_ref):
        @pl.when(pl.program_id(1) == 0)
        def _():
            acc_ref[...] = jnp.zeros_like(acc_ref)

        u = jnp.dot(x_ref[...], wi_ref[...], preferred_element_type=jnp.float32)
        u = jax.nn.gelu(u + bi_ref[...].astype(jnp.float32), approximate=True)
        acc_ref[...] += jnp.dot(u.astype(jnp.bfloat16), wo2_ref[...],
                                preferred_element_type=jnp.float32)

        @pl.when(pl.program_id(1) == gi - 1)
        def _():
            v = (acc_ref[...] + bo2_ref[...].astype(jnp.float32)
                 + x_ref[...].astype(jnp.float32))            # residual = FFN input
            mean = jnp.mean(v, axis=-1, keepdims=True)
            var = jnp.mean((v - mean) ** 2, axis=-1, keepdims=True)
            inv = jax.lax.rsqrt(var + eps)
            o_ref[...] = ((v - mean) * inv * g_ref[...].astype(jnp.float32)
                          + be_ref[...].astype(jnp.float32)).astype(o_ref.dtype)

    return pl.pallas_call(
        kernel,
        out_shape=jax.ShapeDtypeStruct((M, H), out_dtype),
        grid=(gm, gi),
        in_specs=[
            pl.BlockSpec((tm, H), lambda i, j: (i, 0)),     # resident across I axis
            pl.BlockSpec((H, ti), lambda i, j: (0, j)),
            pl.BlockSpec((1, ti), lambda i, j: (0, j)),
            pl.BlockSpec((ti, H), lambda i, j: (j, 0)),
            pl.BlockSpec((1, H), lambda i, j: (0, 0)),
            pl.BlockSpec((1, H), lambda i, j: (0, 0)),
            pl.BlockSpec((1, H), lambda i, j: (0, 0)),
        ],
        out_specs=pl.BlockSpec((tm, H), lambda i, j: (i, 0)),
        scratch_shapes=[pltpu.VMEM((tm, H), jnp.float32)],
        compiler_params=pltpu.CompilerParams(
            dimension_semantics=("parallel", "arbitrary"),
            vmem_limit_bytes=_vmem_limit()),
    )(x, wi, bi, wo2, bo2, gamma, beta)


def _emb_layernorm(word, pos_type, gamma, beta, eps=1e-12, out_dtype=jnp.bfloat16,
                   ts=256):
    """Fused embedding add + LayerNorm: LN(word[b,s,:] + pos_type[s,:]). Stats in f32."""
    B, S, H = word.shape
    ts = _tile_rows(S, ts)

    def kernel(w_ref, p_ref, g_ref, b_ref, o_ref):
        v = w_ref[0].astype(jnp.float32) + p_ref[...].astype(jnp.float32)
        mean = jnp.mean(v, axis=-1, keepdims=True)
        var = jnp.mean((v - mean) ** 2, axis=-1, keepdims=True)
        inv = jax.lax.rsqrt(var + eps)
        o_ref[0] = ((v - mean) * inv * g_ref[...].astype(jnp.float32)
                    + b_ref[...].astype(jnp.float32)).astype(o_ref.dtype)

    return pl.pallas_call(
        kernel,
        out_shape=jax.ShapeDtypeStruct((B, S, H), out_dtype),
        grid=(B, S // ts),
        in_specs=[pl.BlockSpec((1, ts, H), lambda b, s: (b, s, 0)),
                  pl.BlockSpec((ts, H), lambda b, s: (s, 0)),
                  pl.BlockSpec((1, H), lambda b, s: (0, 0)),
                  pl.BlockSpec((1, H), lambda b, s: (0, 0))],
        out_specs=pl.BlockSpec((1, ts, H), lambda b, s: (b, s, 0)),
        compiler_params=pltpu.CompilerParams(
            dimension_semantics=("parallel", "parallel"),
            vmem_limit_bytes=_vmem_limit()),
    )(word, pos_type, gamma, beta)


def _attention(qkv, mask_add, *, NH):
    """Multi-head self-attention directly on the fused (B, S, 3H) QKV activation.

    Heads are processed in lane-dense groups (group width G*D rounded to 128 lanes);
    Q/K/V slices are selected by BlockSpec index maps, so no XLA transposes are needed
    on either side.  Q is already pre-scaled by 1/sqrt(D) (folded into its weights/bias).

    qkv: (B, S, 3H) bf16;  mask_add: (B, 1, S) f32 additive mask (0 / -1e9).
    returns (B, S, H) bf16 with heads merged in the standard BERT column order.
    """
    B, S, threeH = qkv.shape
    H = threeH // 3
    D = H // NH
    G = NH if NH * D <= 128 else max(1, 128 // D)   # heads per grid step (lane-dense)
    while NH % G:
        G -= 1
    NHG = NH // G
    GD = G * D
    tq = _tile_rows(S, 256)
    nq = S // tq

    def kernel(q_ref, k_ref, v_ref, m_ref, o_ref):
        q_slab = q_ref[0]                       # (tq, G*D) bf16
        k_slab = k_ref[0]                       # (S,  G*D) bf16
        v_slab = v_ref[0]
        m = m_ref[0].astype(jnp.float32)        # (1, S)
        outs = []
        for h in range(G):                      # small static loop (G = 2..4 typically)
            q_h = q_slab[:, h * D:(h + 1) * D]  # (tq, D)
            k_h = k_slab[:, h * D:(h + 1) * D]  # (S,  D)
            v_h = v_slab[:, h * D:(h + 1) * D]
            s = jax.lax.dot_general(q_h, k_h, (((1,), (1,)), ((), ())),
                                    preferred_element_type=jnp.float32)  # (tq, S)
            s = s + m
            s = s - jnp.max(s, axis=-1, keepdims=True)
            p = jnp.exp(s)                                                # f32 softmax
            p = p * pl.reciprocal(jnp.sum(p, axis=-1, keepdims=True), approx=True)
            outs.append(jnp.dot(p.astype(v_h.dtype), v_h,
                                preferred_element_type=jnp.float32))      # (tq, D)
        o_ref[0] = jnp.concatenate(outs, axis=-1).astype(o_ref.dtype)     # lane-dense store

    # TODO(synk): for very long sequences (S >> 512) tile the key axis with an
    #             online-softmax (flash) accumulator instead of full-S scores.
    return pl.pallas_call(
        kernel,
        out_shape=jax.ShapeDtypeStruct((B, S, H), jnp.bfloat16),
        grid=(B, NHG, nq),
        in_specs=[
            pl.BlockSpec((1, tq, GD), lambda b, g, qi: (b, qi, g)),            # Q group
            pl.BlockSpec((1, S, GD), lambda b, g, qi: (b, 0, NHG + g)),        # K group
            pl.BlockSpec((1, S, GD), lambda b, g, qi: (b, 0, 2 * NHG + g)),    # V group
            pl.BlockSpec((1, 1, S), lambda b, g, qi: (b, 0, 0)),               # mask
        ],
        out_specs=pl.BlockSpec((1, tq, GD), lambda b, g, qi: (b, qi, g)),
        compiler_params=pltpu.CompilerParams(
            dimension_semantics=("parallel", "parallel", "parallel"),
            vmem_limit_bytes=_vmem_limit()),
    )(qkv, qkv, qkv, mask_add)


# --------------------------------------------------------------------------- model

def init_params(key, *, vocab, max_seq, H, NH, I, L, n_ner, n_doc, type_vocab=2):
    D = H // NH
    scale = 1.0 / (D ** 0.5)
    keys = iter(jax.random.split(key, 8 * (L + 4)))

    def nrm(shape, dtype=jnp.bfloat16):
        return (0.02 * jax.random.normal(next(keys), shape, jnp.float32)).astype(dtype)

    def zeros(n):
        return jnp.zeros((1, n), jnp.float32)

    def ln():
        return jnp.ones((1, H), jnp.float32), jnp.zeros((1, H), jnp.float32)

    def pad_lanes(w, b, n):
        npad = ((n + 127) // 128) * 128
        wp = jnp.zeros((w.shape[0], npad), w.dtype).at[:, :n].set(w)
        bp = jnp.zeros((1, npad), b.dtype).at[:, :n].set(b)
        return wp, bp

    layers = []
    for _ in range(L):
        # Fused QKV weight; the 1/sqrt(D) attention scale is folded into BOTH the Q
        # weight slice and the Q bias (bias is zero here, scaled anyway so the fold
        # stays correct with real pretrained checkpoints).
        wq = nrm((H, H), jnp.float32) * scale
        wk = nrm((H, H), jnp.float32)
        wv = nrm((H, H), jnp.float32)
        bq = jnp.zeros((H,), jnp.float32) * scale
        bk = jnp.zeros((H,), jnp.float32)
        bv = jnp.zeros((H,), jnp.float32)
        w_qkv = jnp.concatenate([wq, wk, wv], axis=1).astype(jnp.bfloat16)
        b_qkv = jnp.concatenate([bq, bk, bv])[None, :]          # (1, 3H) f32
        g1, b1 = ln()
        g2, b2 = ln()
        layers.append(dict(
            w_qkv=w_qkv, b_qkv=b_qkv,
            wo=nrm((H, H)), bo=zeros(H),
            ln1_g=g1, ln1_b=b1,
            wi=nrm((H, I)), bi=zeros(I),
            wo2=nrm((I, H)), bo2=zeros(H),
            ln2_g=g2, ln2_b=b2,
        ))
    eg, eb = ln()
    w_ner, b_ner = pad_lanes(nrm((H, n_ner)), zeros(n_ner), n_ner)   # lane-dense heads
    w_doc, b_doc = pad_lanes(nrm((H, n_doc)), zeros(n_doc), n_doc)
    return dict(
        word_emb=nrm((vocab, H), jnp.bfloat16),        # bf16 gather (halves HBM traffic)
        pos_emb=nrm((max_seq, H), jnp.float32),
        type_emb=nrm((type_vocab, H), jnp.float32),
        emb_ln_g=eg, emb_ln_b=eb,
        layers=layers,
        w_pool=nrm((H, H)), b_pool=zeros(H),
        w_ner=w_ner, b_ner=b_ner,
        w_doc=w_doc, b_doc=b_doc,
    )


@functools.partial(jax.jit, static_argnames=("NH", "n_ner", "n_doc"))
def bert_ner_forward(params, input_ids, attention_mask, *, NH, n_ner, n_doc):
    B, S = input_ids.shape
    H = params["pos_emb"].shape[1]

    # ---- embeddings: bf16 gather (XLA glue) + fused add+LayerNorm (Pallas), bf16 out
    word = params["word_emb"][input_ids]                                  # (B, S, H) bf16
    pos_type = params["pos_emb"][:S] + params["type_emb"][0][None, :]     # (S, H) f32
    h = _emb_layernorm(word, pos_type, params["emb_ln_g"], params["emb_ln_b"])
    h = h.reshape(B * S, H)                                               # free reshape
    # dropout: identity (eval mode)

    # ---- additive attention mask, kept at (B, 1, S): no NH-fold repeat
    mask_add = ((1.0 - attention_mask.astype(jnp.float32)) * -1e9).reshape(B, 1, S)

    for lyr in params["layers"]:
        # fused QKV projection: one matmul over the activation
        qkv = _linear(h, lyr["w_qkv"], lyr["b_qkv"], out_dtype=jnp.bfloat16)  # (B*S, 3H)
        qkv3 = qkv.reshape(B, S, 3 * H)                                       # free reshape
        # attention reads head slices straight from qkv3 (no XLA transposes)
        ctx = _attention(qkv3, mask_add, NH=NH)                               # (B, S, H)
        ctx2d = ctx.reshape(B * S, H)                                         # free reshape
        # fused: out-projection + bias + residual + LayerNorm
        h = _linear_ln(ctx2d, lyr["wo"], lyr["bo"], h, lyr["ln1_g"], lyr["ln1_b"],
                       out_dtype=jnp.bfloat16)
        # fully fused FFN: gelu(x@wi+bi) @ wo2 + bo2 + residual -> LayerNorm
        h = _ffn_ln(h, lyr["wi"], lyr["bi"], lyr["wo2"], lyr["bo2"],
                    lyr["ln2_g"], lyr["ln2_b"], out_dtype=jnp.bfloat16)

    last_hidden = h                                             # (B*S, H) last_hidden_state
    cls = last_hidden.reshape(B, S, H)[:, 0, :]                 # (B, H)
    pooled = _linear(cls, params["w_pool"], params["b_pool"], activation="tanh",
                     out_dtype=jnp.bfloat16)

    # dropout on both heads: identity (eval mode)
    # lane-dense (128-wide) classifier outputs, sliced back to the true label counts
    ner_pad = _linear(last_hidden, params["w_ner"], params["b_ner"], out_dtype=jnp.float32)
    ner_logits = ner_pad[:, :n_ner].reshape(B, S, n_ner)
    doc_pad = _linear(pooled, params["w_doc"], params["b_doc"], out_dtype=jnp.float32)
    doc_logits = doc_pad[:, :n_doc]
    return ner_logits, doc_logits


# --------------------------------------------------------------------------- main

if __name__ == "__main__":
    B, S = 2, 16
    H, NH, I, L = 128, 4, 256, 2
    VOCAB, N_NER, N_DOC = 64, 9, 4

    key = jax.random.PRNGKey(0)
    k_param, k_ids = jax.random.split(key)

    params = init_params(k_param, vocab=VOCAB, max_seq=S, H=H, NH=NH, I=I, L=L,
                         n_ner=N_NER, n_doc=N_DOC)

    input_ids = jax.random.randint(k_ids, (B, S), 0, VOCAB, dtype=jnp.int32)
    attention_mask = jnp.ones((B, S), jnp.int32)
    attention_mask = attention_mask.at[1, S - 4:].set(0)        # pad tail of example 1

    ner_logits, doc_logits = bert_ner_forward(params, input_ids, attention_mask,
                                              NH=NH, n_ner=N_NER, n_doc=N_DOC)
    jax.block_until_ready((ner_logits, doc_logits))

    assert ner_logits.shape == (B, S, N_NER) and ner_logits.dtype == jnp.float32
    assert doc_logits.shape == (B, N_DOC) and doc_logits.dtype == jnp.float32
    assert bool(jnp.isfinite(ner_logits).all()) and bool(jnp.isfinite(doc_logits).all())
    print("KERNEL_OK")
</pallas_src>

<mosaic_0001>
module attributes {stable_mosaic.version = 11 : i64} {
  func.func @kernel(%arg0: i32, %arg1: i32, %arg2: memref<1x16x128xbf16, #tpu.memory_space<vmem>>, %arg3: memref<16x128xf32, #tpu.memory_space<vmem>>, %arg4: memref<1x128xf32, #tpu.memory_space<vmem>>, %arg5: memref<1x128xf32, #tpu.memory_space<vmem>>, %arg6: memref<1x16x128xbf16, #tpu.memory_space<vmem>>) attributes {dimension_semantics = [#tpu.dimension_semantics<parallel>, #tpu.dimension_semantics<parallel>], iteration_bounds = array<i64: 2, 1>, scalar_prefetch = 0 : i64, scratch_operands = 0 : i64, tpu.core_type = #tpu.core_type<tc>, window_params = [{transform_indices = @transform_0, window_bounds = array<i64: 1, 16, 128>}, {transform_indices = @transform_1, window_bounds = array<i64: 16, 128>}, {pipeline_mode = #tpu.pipeline_mode<synchronous>, transform_indices = @transform_2, window_bounds = array<i64: 1, 128>}, {pipeline_mode = #tpu.pipeline_mode<synchronous>, transform_indices = @transform_3, window_bounds = array<i64: 1, 128>}, {transform_indices = @transform_4, window_bounds = array<i64: 1, 16, 128>}]} {
    %c0 = arith.constant 0 : index
    %c0_0 = arith.constant 0 : index
    %c0_1 = arith.constant 0 : index
    %0 = vector.load %arg2[%c0, %c0_0, %c0_1] : memref<1x16x128xbf16, #tpu.memory_space<vmem>>, vector<1x16x128xbf16>
    %1 = vector.shape_cast %0 : vector<1x16x128xbf16> to vector<16x128xbf16>
    %2 = arith.extf %1 : vector<16x128xbf16> to vector<16x128xf32>
    %c0_2 = arith.constant 0 : index
    %c0_3 = arith.constant 0 : index
    %3 = vector.load %arg3[%c0_2, %c0_3] : memref<16x128xf32, #tpu.memory_space<vmem>>, vector<16x128xf32>
    %4 = arith.addf %2, %3 : vector<16x128xf32>
    %cst = arith.constant dense<0.000000e+00> : vector<16xf32>
    %5 = vector.multi_reduction <add>, %4, %cst [1] : vector<16x128xf32> to vector<16xf32>
    %6 = vector.shape_cast %5 : vector<16xf32> to vector<16x1xf32>
    %cst_4 = arith.constant 1.280000e+02 : f32
    %7 = vector.broadcast %cst_4 : f32 to vector<16x1xf32>
    %8 = arith.divf %6, %7 : vector<16x1xf32>
    %9 = vector.broadcast %8 : vector<16x1xf32> to vector<16x128xf32>
    %10 = arith.subf %4, %9 : vector<16x128xf32>
    %11 = arith.mulf %10, %10 : vector<16x128xf32>
    %cst_5 = arith.constant dense<0.000000e+00> : vector<16xf32>
    %12 = vector.multi_reduction <add>, %11, %cst_5 [1] : vector<16x128xf32> to vector<16xf32>
    %13 = vector.shape_cast %12 : vector<16xf32> to vector<16x1xf32>
    %cst_6 = arith.constant 1.280000e+02 : f32
    %14 = vector.broadcast %cst_6 : f32 to vector<16x1xf32>
    %15 = arith.divf %13, %14 : vector<16x1xf32>
    %cst_7 = arith.constant 9.99999996E-13 : f32
    %16 = vector.broadcast %cst_7 : f32 to vector<16x1xf32>
    %17 = arith.addf %15, %16 : vector<16x1xf32>
    %18 = math.rsqrt %17 : vector<16x1xf32>
    %19 = vector.broadcast %8 : vector<16x1xf32> to vector<16x128xf32>
    %20 = arith.subf %4, %19 : vector<16x128xf32>
    %21 = vector.broadcast %18 : vector<16x1xf32> to vector<16x128xf32>
    %22 = arith.mulf %20, %21 : vector<16x128xf32>
    %c0_8 = arith.constant 0 : index
    %c0_9 = arith.constant 0 : index
    %23 = vector.load %arg4[%c0_8, %c0_9] : memref<1x128xf32, #tpu.memory_space<vmem>>, vector<1x128xf32>
    %24 = vector.broadcast %23 : vector<1x128xf32> to vector<16x128xf32>
    %25 = arith.mulf %22, %24 : vector<16x128xf32>
    %c0_10 = arith.constant 0 : index
    %c0_11 = arith.constant 0 : index
    %26 = vector.load %arg5[%c0_10, %c0_11] : memref<1x128xf32, #tpu.memory_space<vmem>>, vector<1x128xf32>
    %27 = vector.broadcast %26 : vector<1x128xf32> to vector<16x128xf32>
    %28 = arith.addf %25, %27 : vector<16x128xf32>
    %29 = arith.truncf %28 : vector<16x128xf32> to vector<16x128xbf16>
    %c0_12 = arith.constant 0 : index
    %c0_13 = arith.constant 0 : index
    %c0_14 = arith.constant 0 : index
    %30 = vector.load %arg6[%c0_12, %c0_13, %c0_14] : memref<1x16x128xbf16, #tpu.memory_space<vmem>>, vector<1x16x128xbf16>
    %31 = vector.shape_cast %30 : vector<1x16x128xbf16> to vector<16x128xbf16>
    %32 = vector.shape_cast %29 : vector<16x128xbf16> to vector<1x16x128xbf16>
    tpu.vector_store %arg6[%c0_12, %c0_13, %c0_14], %32 {strides = array<i32>} : memref<1x16x128xbf16, #tpu.memory_space<vmem>>, vector<1x16x128xbf16>,
    return
  }
  func.func @transform_0(%arg0: i32, %arg1: i32) -> (i32, i32, i32) {
    %c0_i32 = arith.constant 0 : i32
    %c0_i32_0 = arith.constant 0 : i32
    return %arg0, %arg1, %c0_i32 : i32, i32, i32
  }
  func.func @transform_1(%arg0: i32, %arg1: i32) -> (i32, i32) {
    %c0_i32 = arith.constant 0 : i32
    %c0_i32_0 = arith.constant 0 : i32
    return %arg1, %c0_i32 : i32, i32
  }
  func.func @transform_2(%arg0: i32, %arg1: i32) -> (i32, i32) {
    %c0_i32 = arith.constant 0 : i32
    %c0_i32_0 = arith.constant 0 : i32
    %c0_i32_1 = arith.constant 0 : i32
    return %c0_i32, %c0_i32_0 : i32, i32
  }
  func.func @transform_3(%arg0: i32, %arg1: i32) -> (i32, i32) {
    %c0_i32 = arith.constant 0 : i32
    %c0_i32_0 = arith.constant 0 : i32
    %c0_i32_1 = arith.constant 0 : i32
    return %c0_i32, %c0_i32_0 : i32, i32
  }
  func.func @transform_4(%arg0: i32, %arg1: i32) -> (i32, i32, i32) {
    %c0_i32 = arith.constant 0 : i32
    %c0_i32_0 = arith.constant 0 : i32
    return %arg0, %arg1, %c0_i32 : i32, i32, i32
  }
}

module attributes {stable_mosaic.version = 11 : i64} {
  func.func @kernel(%arg0: i32, %arg1: i32, %arg2: i32, %arg3: memref<32x128xbf16, #tpu.memory_space<vmem>>, %arg4: memref<128x384xbf16, #tpu.memory_space<vmem>>, %arg5: memref<1x384xf32, #tpu.memory_space<vmem>>, %arg6: memref<32x384xbf16, #tpu.memory_space<vmem>>, %arg7: memref<32x384xf32, #tpu.memory_space<vmem>>) attributes {dimension_semantics = [#tpu.dimension_semantics<parallel>, #tpu.dimension_semantics<parallel>, #tpu.dimension_semantics<arbitrary>], iteration_bounds = array<i64: 1, 1, 1>, scalar_prefetch = 0 : i64, scratch_operands = 1 : i64, tpu.core_type = #tpu.core_type<tc>, window_params = [{transform_indices = @transform_0, window_bounds = array<i64: 32, 128>}, {transform_indices = @transform_1, window_bounds = array<i64: 128, 384>}, {transform_indices = @transform_2, window_bounds = array<i64: 1, 384>}, {transform_indices = @transform_3, window_bounds = array<i64: 32, 384>}]} {
    %c0_i32 = arith.constant 0 : i32
    %0 = arith.cmpi eq, %arg2, %c0_i32 : i32
    %1 = arith.extui %0 : i1 to i32
    %c0_i32_0 = arith.constant 0 : i32
    %2 = arith.cmpi ne, %1, %c0_i32_0 : i32
    scf.if %2 {
      %cst_10 = arith.constant 0.000000e+00 : f32
      %12 = vector.broadcast %cst_10 : f32 to vector<32x384xf32>
      %c0_11 = arith.constant 0 : index
      %c0_12 = arith.constant 0 : index
      %13 = vector.load %arg7[%c0_11, %c0_12] : memref<32x384xf32, #tpu.memory_space<vmem>>, vector<32x384xf32>
      tpu.vector_store %arg7[%c0_11, %c0_12], %12 {strides = array<i32>} : memref<32x384xf32, #tpu.memory_space<vmem>>, vector<32x384xf32>,
    } else {
    }
    %c0 = arith.constant 0 : index
    %c0_1 = arith.constant 0 : index
    %3 = vector.load %arg7[%c0, %c0_1] : memref<32x384xf32, #tpu.memory_space<vmem>>, vector<32x384xf32>
    %c0_2 = arith.constant 0 : index
    %c0_3 = arith.constant 0 : index
    %4 = vector.load %arg3[%c0_2, %c0_3] : memref<32x128xbf16, #tpu.memory_space<vmem>>, vector<32x128xbf16>
    %c0_4 = arith.constant 0 : index
    %c0_5 = arith.constant 0 : index
    %5 = vector.load %arg4[%c0_4, %c0_5] : memref<128x384xbf16, #tpu.memory_space<vmem>>, vector<128x384xbf16>
    %cst = arith.constant dense<0.000000e+00> : vector<32x384xf32>
    %6 = tpu.matmul %4, %5, %cst {dimension_numbers = #tpu.dot_dimension_numbers<[1], [0], [0], [1], [0, 0, 1, 1], [], []>} : vector<32x128xbf16>, vector<128x384xbf16>, vector<32x384xf32> -> vector<32x384xf32>
    %7 = arith.addf %3, %6 : vector<32x384xf32>
    %c0_6 = arith.constant 0 : index
    %c0_7 = arith.constant 0 : index
    %8 = vector.load %arg7[%c0_6, %c0_7] : memref<32x384xf32, #tpu.memory_space<vmem>>, vector<32x384xf32>
    tpu.vector_store %arg7[%c0_6, %c0_7], %7 {strides = array<i32>} : memref<32x384xf32, #tpu.memory_space<vmem>>, vector<32x384xf32>,
    %c0_i32_8 = arith.constant 0 : i32
    %9 = arith.cmpi eq, %arg2, %c0_i32_8 : i32
    %10 = arith.extui %9 : i1 to i32
    %c0_i32_9 = arith.constant 0 : i32
    %11 = arith.cmpi ne, %10, %c0_i32_9 : i32
    scf.if %11 {
      %c0_10 = arith.constant 0 : index
      %c0_11 = arith.constant 0 : index
      %12 = vector.load %arg7[%c0_10, %c0_11] : memref<32x384xf32, #tpu.memory_space<vmem>>, vector<32x384xf32>
      %c0_12 = arith.constant 0 : index
      %c0_13 = arith.constant 0 : index
      %13 = vector.load %arg5[%c0_12, %c0_13] : memref<1x384xf32, #tpu.memory_space<vmem>>, vector<1x384xf32>
      %14 = vector.broadcast %13 : vector<1x384xf32> to vector<32x384xf32>
      %15 = arith.addf %12, %14 : vector<32x384xf32>
      %16 = arith.truncf %15 : vector<32x384xf32> to vector<32x384xbf16>
      %c0_14 = arith.constant 0 : index
      %c0_15 = arith.constant 0 : index
      %17 = vector.load %arg6[%c0_14, %c0_15] : memref<32x384xbf16, #tpu.memory_space<vmem>>, vector<32x384xbf16>
      tpu.vector_store %arg6[%c0_14, %c0_15], %16 {strides = array<i32>} : memref<32x384xbf16, #tpu.memory_space<vmem>>, vector<32x384xbf16>,
    } else {
    }
    return
  }
  func.func @transform_0(%arg0: i32, %arg1: i32, %arg2: i32) -> (i32, i32) {
    %c0_i32 = arith.constant 0 : i32
    return %arg0, %arg2 : i32, i32
  }
  func.func @transform_1(%arg0: i32, %arg1: i32, %arg2: i32) -> (i32, i32) {
    %c0_i32 = arith.constant 0 : i32
    return %arg2, %arg1 : i32, i32
  }
  func.func @transform_2(%arg0: i32, %arg1: i32, %arg2: i32) -> (i32, i32) {
    %c0_i32 = arith.constant 0 : i32
    %c0_i32_0 = arith.constant 0 : i32
    return %c0_i32, %arg1 : i32, i32
  }
  func.func @transform_3(%arg0: i32, %arg1: i32, %arg2: i32) -> (i32, i32) {
    %c0_i32 = arith.constant 0 : i32
    return %arg0, %arg1 : i32, i32
  }
}

module attributes {stable_mosaic.version = 11 : i64} {
  func.func @kernel(%arg0: i32, %arg1: i32, %arg2: memref<32x128xbf16, #tpu.memory_space<vmem>>, %arg3: memref<128x128xbf16, #tpu.memory_space<vmem>>, %arg4: memref<1x128xf32, #tpu.memory_space<vmem>>, %arg5: memref<32x128xbf16, #tpu.memory_space<vmem>>, %arg6: memref<1x128xf32, #tpu.memory_space<vmem>>, %arg7: memref<1x128xf32, #tpu.memory_space<vmem>>, %arg8: memref<32x128xbf16, #tpu.memory_space<vmem>>, %arg9: memref<32x128xf32, #tpu.memory_space<vmem>>) attributes {dimension_semantics = [#tpu.dimension_semantics<parallel>, #tpu.dimension_semantics<arbitrary>], iteration_bounds = array<i64: 1, 1>, scalar_prefetch = 0 : i64, scratch_operands = 1 : i64, tpu.core_type = #tpu.core_type<tc>, window_params = [{transform_indices = @transform_0, window_bounds = array<i64: 32, 128>}, {transform_indices = @transform_1, window_bounds = array<i64: 128, 128>}, {pipeline_mode = #tpu.pipeline_mode<synchronous>, transform_indices = @transform_2, window_bounds = array<i64: 1, 128>}, {transform_indices = @transform_3, window_bounds = array<i64: 32, 128>}, {pipeline_mode = #tpu.pipeline_mode<synchronous>, transform_indices = @transform_4, window_bounds = array<i64: 1, 128>}, {pipeline_mode = #tpu.pipeline_mode<synchronous>, transform_indices = @transform_5, window_bounds = array<i64: 1, 128>}, {transform_indices = @transform_6, window_bounds = array<i64: 32, 128>}]} {
    %c0_i32 = arith.constant 0 : i32
    %0 = arith.cmpi eq, %arg1, %c0_i32 : i32
    %1 = arith.extui %0 : i1 to i32
    %c0_i32_0 = arith.constant 0 : i32
    %2 = arith.cmpi ne, %1, %c0_i32_0 : i32
    scf.if %2 {
      %cst_10 = arith.constant 0.000000e+00 : f32
      %12 = vector.broadcast %cst_10 : f32 to vector<32x128xf32>
      %c0_11 = arith.constant 0 : index
      %c0_12 = arith.constant 0 : index
      %13 = vector.load %arg9[%c0_11, %c0_12] : memref<32x128xf32, #tpu.memory_space<vmem>>, vector<32x128xf32>
      tpu.vector_store %arg9[%c0_11, %c0_12], %12 {strides = array<i32>} : memref<32x128xf32, #tpu.memory_space<vmem>>, vector<32x128xf32>,
    } else {
    }
    %c0 = arith.constant 0 : index
    %c0_1 = arith.constant 0 : index
    %3 = vector.load %arg9[%c0, %c0_1] : memref<32x128xf32, #tpu.memory_space<vmem>>, vector<32x128xf32>
    %c0_2 = arith.constant 0 : index
    %c0_3 = arith.constant 0 : index
    %4 = vector.load %arg2[%c0_2, %c0_3] : memref<32x128xbf16, #tpu.memory_space<vmem>>, vector<32x128xbf16>
    %c0_4 = arith.constant 0 : index
    %c0_5 = arith.constant 0 : index
    %5 = vector.load %arg3[%c0_4, %c0_5] : memref<128x128xbf16, #tpu.memory_space<vmem>>, vector<128x128xbf16>
    %cst = arith.constant dense<0.000000e+00> : vector<32x128xf32>
    %6 = tpu.matmul %4, %5, %cst {dimension_numbers = #tpu.dot_dimension_numbers<[1], [0], [0], [1], [0, 0, 1, 1], [], []>} : vector<32x128xbf16>, vector<128x128xbf16>, vector<32x128xf32> -> vector<32x128xf32>
    %7 = arith.addf %3, %6 : vector<32x128xf32>
    %c0_6 = arith.constant 0 : index
    %c0_7 = arith.constant 0 : index
    %8 = vector.load %arg9[%c0_6, %c0_7] : memref<32x128xf32, #tpu.memory_space<vmem>>, vector<32x128xf32>
    tpu.vector_store %arg9[%c0_6, %c0_7], %7 {strides = array<i32>} : memref<32x128xf32, #tpu.memory_space<vmem>>, vector<32x128xf32>,
    %c0_i32_8 = arith.constant 0 : i32
    %9 = arith.cmpi eq, %arg1, %c0_i32_8 : i32
    %10 = arith.extui %9 : i1 to i32
    %c0_i32_9 = arith.constant 0 : i32
    %11 = arith.cmpi ne, %10, %c0_i32_9 : i32
    scf.if %11 {
      %c0_10 = arith.constant 0 : index
      %c0_11 = arith.constant 0 : index
      %12 = vector.load %arg9[%c0_10, %c0_11] : memref<32x128xf32, #tpu.memory_space<vmem>>, vector<32x128xf32>
      %c0_12 = arith.constant 0 : index
      %c0_13 = arith.constant 0 : index
      %13 = vector.load %arg4[%c0_12, %c0_13] : memref<1x128xf32, #tpu.memory_space<vmem>>, vector<1x128xf32>
      %14 = vector.broadcast %13 : vector<1x128xf32> to vector<32x128xf32>
      %15 = arith.addf %12, %14 : vector<32x128xf32>
      %c0_14 = arith.constant 0 : index
      %c0_15 = arith.constant 0 : index
      %16 = vector.load %arg5[%c0_14, %c0_15] : memref<32x128xbf16, #tpu.memory_space<vmem>>, vector<32x128xbf16>
      %17 = arith.extf %16 : vector<32x128xbf16> to vector<32x128xf32>
      %18 = arith.addf %15, %17 : vector<32x128xf32>
      %cst_16 = arith.constant dense<0.000000e+00> : vector<32xf32>
      %19 = vector.multi_reduction <add>, %18, %cst_16 [1] : vector<32x128xf32> to vector<32xf32>
      %20 = vector.shape_cast %19 : vector<32xf32> to vector<32x1xf32>
      %cst_17 = arith.constant 1.280000e+02 : f32
      %21 = vector.broadcast %cst_17 : f32 to vector<32x1xf32>
      %22 = arith.divf %20, %21 : vector<32x1xf32>
      %23 = vector.broadcast %22 : vector<32x1xf32> to vector<32x128xf32>
      %24 = arith.subf %18, %23 : vector<32x128xf32>
      %25 = arith.mulf %24, %24 : vector<32x128xf32>
      %cst_18 = arith.constant dense<0.000000e+00> : vector<32xf32>
      %26 = vector.multi_reduction <add>, %25, %cst_18 [1] : vector<32x128xf32> to vector<32xf32>
      %27 = vector.shape_cast %26 : vector<32xf32> to vector<32x1xf32>
      %cst_19 = arith.constant 1.280000e+02 : f32
      %28 = vector.broadcast %cst_19 : f32 to vector<32x1xf32>
      %29 = arith.divf %27, %28 : vector<32x1xf32>
      %cst_20 = arith.constant 9.99999996E-13 : f32
      %30 = vector.broadcast %cst_20 : f32 to vector<32x1xf32>
      %31 = arith.addf %29, %30 : vector<32x1xf32>
      %32 = math.rsqrt %31 : vector<32x1xf32>
      %33 = vector.broadcast %22 : vector<32x1xf32> to vector<32x128xf32>
      %34 = arith.subf %18, %33 : vector<32x128xf32>
      %35 = vector.broadcast %32 : vector<32x1xf32> to vector<32x128xf32>
      %36 = arith.mulf %34, %35 : vector<32x128xf32>
      %c0_21 = arith.constant 0 : index
      %c0_22 = arith.constant 0 : index
      %37 = vector.load %arg6[%c0_21, %c0_22] : memref<1x128xf32, #tpu.memory_space<vmem>>, vector<1x128xf32>
      %38 = vector.broadcast %37 : vector<1x128xf32> to vector<32x128xf32>
      %39 = arith.mulf %36, %38 : vector<32x128xf32>
      %c0_23 = arith.constant 0 : index
      %c0_24 = arith.constant 0 : index
      %40 = vector.load %arg7[%c0_23, %c0_24] : memref<1x128xf32, #tpu.memory_space<vmem>>, vector<1x128xf32>
      %41 = vector.broadcast %40 : vector<1x128xf32> to vector<32x128xf32>
      %42 = arith.addf %39, %41 : vector<32x128xf32>
      %43 = arith.truncf %42 : vector<32x128xf32> to vector<32x128xbf16>
      %c0_25 = arith.constant 0 : index
      %c0_26 = arith.constant 0 : index
      %44 = vector.load %arg8[%c0_25, %c0_26] : memref<32x128xbf16, #tpu.memory_space<vmem>>, vector<32x128xbf16>
      tpu.vector_store %arg8[%c0_25, %c0_26], %43 {strides = array<i32>} : memref<32x128xbf16, #tpu.memory_space<vmem>>, vector<32x128xbf16>,
    } else {
    }
    return
  }
  func.func @transform_0(%arg0: i32, %arg1: i32) -> (i32, i32) {
    %c0_i32 = arith.constant 0 : i32
    return %arg0, %arg1 : i32, i32
  }
  func.func @transform_1(%arg0: i32, %arg1: i32) -> (i32, i32) {
    %c0_i32 = arith.constant 0 : i32
    %c0_i32_0 = arith.constant 0 : i32
    return %arg1, %c0_i32 : i32, i32
  }
  func.func @transform_2(%arg0: i32, %arg1: i32) -> (i32, i32) {
    %c0_i32 = arith.constant 0 : i32
    %c0_i32_0 = arith.constant 0 : i32
    %c0_i32_1 = arith.constant 0 : i32
    return %c0_i32, %c0_i32_0 : i32, i32
  }
  func.func @transform_3(%arg0: i32, %arg1: i32) -> (i32, i32) {
    %c0_i32 = arith.constant 0 : i32
    %c0_i32_0 = arith.constant 0 : i32
    return %arg0, %c0_i32 : i32, i32
  }
  func.func @transform_4(%arg0: i32, %arg1: i32) -> (i32, i32) {
    %c0_i32 = arith.constant 0 : i32
    %c0_i32_0 = arith.constant 0 : i32
    %c0_i32_1 = arith.constant 0 : i32
    return %c0_i32, %c0_i32_0 : i32, i32
  }
  func.func @transform_5(%arg0: i32, %arg1: i32) -> (i32, i32) {
    %c0_i32 = arith.constant 0 : i32
    %c0_i32_0 = arith.constant 0 : i32
    %c0_i32_1 = arith.constant 0 : i32
    return %c0_i32, %c0_i32_0 : i32, i32
  }
  func.func @transform_6(%arg0: i32, %arg1: i32) -> (i32, i32) {
    %c0_i32 = arith.constant 0 : i32
    %c0_i32_0 = arith.constant 0 : i32
    return %arg0, %c0_i32 : i32, i32
  }
}

module attributes {stable_mosaic.version = 11 : i64} {
  func.func @kernel(%arg0: i32, %arg1: i32, %arg2: i32, %arg3: memref<1x16x128xbf16, #tpu.memory_space<vmem>>, %arg4: memref<1x16x128xbf16, #tpu.memory_space<vmem>>, %arg5: memref<1x16x128xbf16, #tpu.memory_space<vmem>>, %arg6: memref<1x1x16xf32, #tpu.memory_space<vmem>>, %arg7: memref<1x16x128xbf16, #tpu.memory_space<vmem>>) attributes {dimension_semantics = [#tpu.dimension_semantics<parallel>, #tpu.dimension_semantics<parallel>, #tpu.dimension_semantics<parallel>], iteration_bounds = array<i64: 2, 1, 1>, scalar_prefetch = 0 : i64, scratch_operands = 0 : i64, tpu.core_type = #tpu.core_type<tc>, window_params = [{transform_indices = @transform_0, window_bounds = array<i64: 1, 16, 128>}, {transform_indices = @transform_1, window_bounds = array<i64: 1, 16, 128>}, {transform_indices = @transform_2, window_bounds = array<i64: 1, 16, 128>}, {transform_indices = @transform_3, window_bounds = array<i64: 1, 1, 16>}, {transform_indices = @transform_4, window_bounds = array<i64: 1, 16, 128>}]} {
    %c0 = arith.constant 0 : index
    %c0_0 = arith.constant 0 : index
    %c0_1 = arith.constant 0 : index
    %0 = vector.load %arg3[%c0, %c0_0, %c0_1] : memref<1x16x128xbf16, #tpu.memory_space<vmem>>, vector<1x16x128xbf16>
    %1 = vector.shape_cast %0 : vector<1x16x128xbf16> to vector<16x128xbf16>
    %c0_2 = arith.constant 0 : index
    %c0_3 = arith.constant 0 : index
    %c0_4 = arith.constant 0 : index
    %2 = vector.load %arg4[%c0_2, %c0_3, %c0_4] : memref<1x16x128xbf16, #tpu.memory_space<vmem>>, vector<1x16x128xbf16>
    %3 = vector.shape_cast %2 : vector<1x16x128xbf16> to vector<16x128xbf16>
    %c0_5 = arith.constant 0 : index
    %c0_6 = arith.constant 0 : index
    %c0_7 = arith.constant 0 : index
    %4 = vector.load %arg5[%c0_5, %c0_6, %c0_7] : memref<1x16x128xbf16, #tpu.memory_space<vmem>>, vector<1x16x128xbf16>
    %5 = vector.shape_cast %4 : vector<1x16x128xbf16> to vector<16x128xbf16>
    %c0_8 = arith.constant 0 : index
    %c0_9 = arith.constant 0 : index
    %c0_10 = arith.constant 0 : index
    %6 = vector.load %arg6[%c0_8, %c0_9, %c0_10] : memref<1x1x16xf32, #tpu.memory_space<vmem>>, vector<1x1x16xf32>
    %7 = vector.shape_cast %6 : vector<1x1x16xf32> to vector<1x16xf32>
    %8 = vector.extract_strided_slice %1 {offsets = [0, 0], sizes = [16, 32], strides = [1, 1]} : vector<16x128xbf16> to vector<16x32xbf16>
    %9 = vector.extract_strided_slice %3 {offsets = [0, 0], sizes = [16, 32], strides = [1, 1]} : vector<16x128xbf16> to vector<16x32xbf16>
    %10 = vector.extract_strided_slice %5 {offsets = [0, 0], sizes = [16, 32], strides = [1, 1]} : vector<16x128xbf16> to vector<16x32xbf16>
    %cst = arith.constant dense<0.000000e+00> : vector<16x16xf32>
    %11 = tpu.matmul %8, %9, %cst {dimension_numbers = #tpu.dot_dimension_numbers<[1], [1], [0], [0], [0, 0, 1, 0], [], []>} : vector<16x32xbf16>, vector<16x32xbf16>, vector<16x16xf32> -> vector<16x16xf32>
    %12 = vector.broadcast %7 : vector<1x16xf32> to vector<16x16xf32>
    %13 = arith.addf %11, %12 : vector<16x16xf32>
    %cst_11 = arith.constant dense<0xFF800000> : vector<16xf32>
    %14 = vector.multi_reduction <maximumf>, %13, %cst_11 [1] : vector<16x16xf32> to vector<16xf32>
    %15 = vector.shape_cast %14 : vector<16xf32> to vector<16x1xf32>
    %16 = vector.broadcast %15 : vector<16x1xf32> to vector<16x16xf32>
    %17 = arith.subf %13, %16 : vector<16x16xf32>
    %18 = math.exp %17 : vector<16x16xf32>
    %cst_12 = arith.constant dense<0.000000e+00> : vector<16xf32>
    %19 = vector.multi_reduction <add>, %18, %cst_12 [1] : vector<16x16xf32> to vector<16xf32>
    %20 = vector.shape_cast %19 : vector<16xf32> to vector<16x1xf32>
    %21 = tpu.reciprocal %20 {approx = true} : vector<16x1xf32> -> vector<16x1xf32>
    %22 = vector.broadcast %21 : vector<16x1xf32> to vector<16x16xf32>
    %23 = arith.mulf %18, %22 : vector<16x16xf32>
    %24 = arith.truncf %23 : vector<16x16xf32> to vector<16x16xbf16>
    %cst_13 = arith.constant dense<0.000000e+00> : vector<16x32xf32>
    %25 = tpu.matmul %24, %10, %cst_13 {dimension_numbers = #tpu.dot_dimension_numbers<[1], [0], [0], [1], [0, 0, 1, 1], [], []>} : vector<16x16xbf16>, vector<16x32xbf16>, vector<16x32xf32> -> vector<16x32xf32>
    %26 = vector.extract_strided_slice %1 {offsets = [0, 32], sizes = [16, 32], strides = [1, 1]} : vector<16x128xbf16> to vector<16x32xbf16>
    %27 = vector.extract_strided_slice %3 {offsets = [0, 32], sizes = [16, 32], strides = [1, 1]} : vector<16x128xbf16> to vector<16x32xbf16>
    %28 = vector.extract_strided_slice %5 {offsets = [0, 32], sizes = [16, 32], strides = [1, 1]} : vector<16x128xbf16> to vector<16x32xbf16>
    %cst_14 = arith.constant dense<0.000000e+00> : vector<16x16xf32>
    %29 = tpu.matmul %26, %27, %cst_14 {dimension_numbers = #tpu.dot_dimension_numbers<[1], [1], [0], [0], [0, 0, 1, 0], [], []>} : vector<16x32xbf16>, vector<16x32xbf16>, vector<16x16xf32> -> vector<16x16xf32>
    %30 = vector.broadcast %7 : vector<1x16xf32> to vector<16x16xf32>
    %31 = arith.addf %29, %30 : vector<16x16xf32>
    %cst_15 = arith.constant dense<0xFF800000> : vector<16xf32>
    %32 = vector.multi_reduction <maximumf>, %31, %cst_15 [1] : vector<16x16xf32> to vector<16xf32>
    %33 = vector.shape_cast %32 : vector<16xf32> to vector<16x1xf32>
    %34 = vector.broadcast %33 : vector<16x1xf32> to vector<16x16xf32>
    %35 = arith.subf %31, %34 : vector<16x16xf32>
    %36 = math.exp %35 : vector<16x16xf32>
    %cst_16 = arith.constant dense<0.000000e+00> : vector<16xf32>
    %37 = vector.multi_reduction <add>, %36, %cst_16 [1] : vector<16x16xf32> to vector<16xf32>
    %38 = vector.shape_cast %37 : vector<16xf32> to vector<16x1xf32>
    %39 = tpu.reciprocal %38 {approx = true} : vector<16x1xf32> -> vector<16x1xf32>
    %40 = vector.broadcast %39 : vector<16x1xf32> to vector<16x16xf32>
    %41 = arith.mulf %36, %40 : vector<16x16xf32>
    %42 = arith.truncf %41 : vector<16x16xf32> to vector<16x16xbf16>
    %cst_17 = arith.constant dense<0.000000e+00> : vector<16x32xf32>
    %43 = tpu.matmul %42, %28, %cst_17 {dimension_numbers = #tpu.dot_dimension_numbers<[1], [0], [0], [1], [0, 0, 1, 1], [], []>} : vector<16x16xbf16>, vector<16x32xbf16>, vector<16x32xf32> -> vector<16x32xf32>
    %44 = vector.extract_strided_slice %1 {offsets = [0, 64], sizes = [16, 32], strides = [1, 1]} : vector<16x128xbf16> to vector<16x32xbf16>
    %45 = vector.extract_strided_slice %3 {offsets = [0, 64], sizes = [16, 32], strides = [1, 1]} : vector<16x128xbf16> to vector<16x32xbf16>
    %46 = vector.extract_strided_slice %5 {offsets = [0, 64], sizes = [16, 32], strides = [1, 1]} : vector<16x128xbf16> to vector<16x32xbf16>
    %cst_18 = arith.constant dense<0.000000e+00> : vector<16x16xf32>
    %47 = tpu.matmul %44, %45, %cst_18 {dimension_numbers = #tpu.dot_dimension_numbers<[1], [1], [0], [0], [0, 0, 1, 0], [], []>} : vector<16x32xbf16>, vector<16x32xbf16>, vector<16x16xf32> -> vector<16x16xf32>
    %48 = vector.broadcast %7 : vector<1x16xf32> to vector<16x16xf32>
    %49 = arith.addf %47, %48 : vector<16x16xf32>
    %cst_19 = arith.constant dense<0xFF800000> : vector<16xf32>
    %50 = vector.multi_reduction <maximumf>, %49, %cst_19 [1] : vector<16x16xf32> to vector<16xf32>
    %51 = vector.shape_cast %50 : vector<16xf32> to vector<16x1xf32>
    %52 = vector.broadcast %51 : vector<16x1xf32> to vector<16x16xf32>
    %53 = arith.subf %49, %52 : vector<16x16xf32>
    %54 = math.exp %53 : vector<16x16xf32>
    %cst_20 = arith.constant dense<0.000000e+00> : vector<16xf32>
    %55 = vector.multi_reduction <add>, %54, %cst_20 [1] : vector<16x16xf32> to vector<16xf32>
    %56 = vector.shape_cast %55 : vector<16xf32> to vector<16x1xf32>
    %57 = tpu.reciprocal %56 {approx = true} : vector<16x1xf32> -> vector<16x1xf32>
    %58 = vector.broadcast %57 : vector<16x1xf32> to vector<16x16xf32>
    %59 = arith.mulf %54, %58 : vector<16x16xf32>
    %60 = arith.truncf %59 : vector<16x16xf32> to vector<16x16xbf16>
    %cst_21 = arith.constant dense<0.000000e+00> : vector<16x32xf32>
    %61 = tpu.matmul %60, %46, %cst_21 {dimension_numbers = #tpu.dot_dimension_numbers<[1], [0], [0], [1], [0, 0, 1, 1], [], []>} : vector<16x16xbf16>, vector<16x32xbf16>, vector<16x32xf32> -> vector<16x32xf32>
    %62 = vector.extract_strided_slice %1 {offsets = [0, 96], sizes = [16, 32], strides = [1, 1]} : vector<16x128xbf16> to vector<16x32xbf16>
    %63 = vector.extract_strided_slice %3 {offsets = [0, 96], sizes = [16, 32], strides = [1, 1]} : vector<16x128xbf16> to vector<16x32xbf16>
    %64 = vector.extract_strided_slice %5 {offsets = [0, 96], sizes = [16, 32], strides = [1, 1]} : vector<16x128xbf16> to vector<16x32xbf16>
    %cst_22 = arith.constant dense<0.000000e+00> : vector<16x16xf32>
    %65 = tpu.matmul %62, %63, %cst_22 {dimension_numbers = #tpu.dot_dimension_numbers<[1], [1], [0], [0], [0, 0, 1, 0], [], []>} : vector<16x32xbf16>, vector<16x32xbf16>, vector<16x16xf32> -> vector<16x16xf32>
    %66 = vector.broadcast %7 : vector<1x16xf32> to vector<16x16xf32>
    %67 = arith.addf %65, %66 : vector<16x16xf32>
    %cst_23 = arith.constant dense<0xFF800000> : vector<16xf32>
    %68 = vector.multi_reduction <maximumf>, %67, %cst_23 [1] : vector<16x16xf32> to vector<16xf32>
    %69 = vector.shape_cast %68 : vector<16xf32> to vector<16x1xf32>
    %70 = vector.broadcast %69 : vector<16x1xf32> to vector<16x16xf32>
    %71 = arith.subf %67, %70 : vector<16x16xf32>
    %72 = math.exp %71 : vector<16x16xf32>
    %cst_24 = arith.constant dense<0.000000e+00> : vector<16xf32>
    %73 = vector.multi_reduction <add>, %72, %cst_24 [1] : vector<16x16xf32> to vector<16xf32>
    %74 = vector.shape_cast %73 : vector<16xf32> to vector<16x1xf32>
    %75 = tpu.reciprocal %74 {approx = true} : vector<16x1xf32> -> vector<16x1xf32>
    %76 = vector.broadcast %75 : vector<16x1xf32> to vector<16x16xf32>
    %77 = arith.mulf %72, %76 : vector<16x16xf32>
    %78 = arith.truncf %77 : vector<16x16xf32> to vector<16x16xbf16>
    %cst_25 = arith.constant dense<0.000000e+00> : vector<16x32xf32>
    %79 = tpu.matmul %78, %64, %cst_25 {dimension_numbers = #tpu.dot_dimension_numbers<[1], [0], [0], [1], [0, 0, 1, 1], [], []>} : vector<16x16xbf16>, vector<16x32xbf16>, vector<16x32xf32> -> vector<16x32xf32>
    %80 = tpu.concatenate %25, %43, %61, %79 in 1 : vector<16x32xf32>, vector<16x32xf32>, vector<16x32xf32>, vector<16x32xf32> -> vector<16x128xf32>
    %81 = arith.truncf %80 : vector<16x128xf32> to vector<16x128xbf16>
    %c0_26 = arith.constant 0 : index
    %c0_27 = arith.constant 0 : index
    %c0_28 = arith.constant 0 : index
    %82 = vector.load %arg7[%c0_26, %c0_27, %c0_28] : memref<1x16x128xbf16, #tpu.memory_space<vmem>>, vector<1x16x128xbf16>
    %83 = vector.shape_cast %82 : vector<1x16x128xbf16> to vector<16x128xbf16>
    %84 = vector.shape_cast %81 : vector<16x128xbf16> to vector<1x16x128xbf16>
    tpu.vector_store %arg7[%c0_26, %c0_27, %c0_28], %84 {strides = array<i32>} : memref<1x16x128xbf16, #tpu.memory_space<vmem>>, vector<1x16x128xbf16>,
    return
  }
  func.func @transform_0(%arg0: i32, %arg1: i32, %arg2: i32) -> (i32, i32, i32) {
    %c0_i32 = arith.constant 0 : i32
    return %arg0, %arg2, %arg1 : i32, i32, i32
  }
  func.func @transform_1(%arg0: i32, %arg1: i32, %arg2: i32) -> (i32, i32, i32) {
    %c1_i32 = arith.constant 1 : i32
    %0 = arith.addi %c1_i32, %arg1 : i32
    %c0_i32 = arith.constant 0 : i32
    %c0_i32_0 = arith.constant 0 : i32
    return %arg0, %c0_i32, %0 : i32, i32, i32
  }
  func.func @transform_2(%arg0: i32, %arg1: i32, %arg2: i32) -> (i32, i32, i32) {
    %c2_i32 = arith.constant 2 : i32
    %0 = arith.addi %c2_i32, %arg1 : i32
    %c0_i32 = arith.constant 0 : i32
    %c0_i32_0 = arith.constant 0 : i32
    return %arg0, %c0_i32, %0 : i32, i32, i32
  }
  func.func @transform_3(%arg0: i32, %arg1: i32, %arg2: i32) -> (i32, i32, i32) {
    %c0_i32 = arith.constant 0 : i32
    %c0_i32_0 = arith.constant 0 : i32
    %c0_i32_1 = arith.constant 0 : i32
    return %arg0, %c0_i32, %c0_i32_0 : i32, i32, i32
  }
  func.func @transform_4(%arg0: i32, %arg1: i32, %arg2: i32) -> (i32, i32, i32) {
    %c0_i32 = arith.constant 0 : i32
    return %arg0, %arg2, %arg1 : i32, i32, i32
  }
}

module attributes {stable_mosaic.version = 11 : i64} {
  func.func @kernel(%arg0: i32, %arg1: i32, %arg2: memref<32x128xbf16, #tpu.memory_space<vmem>>, %arg3: memref<128x256xbf16, #tpu.memory_space<vmem>>, %arg4: memref<1x256xf32, #tpu.memory_space<vmem>>, %arg5: memref<256x128xbf16, #tpu.memory_space<vmem>>, %arg6: memref<1x128xf32, #tpu.memory_space<vmem>>, %arg7: memref<1x128xf32, #tpu.memory_space<vmem>>, %arg8: memref<1x128xf32, #tpu.memory_space<vmem>>, %arg9: memref<32x128xbf16, #tpu.memory_space<vmem>>, %arg10: memref<32x128xf32, #tpu.memory_space<vmem>>) attributes {dimension_semantics = [#tpu.dimension_semantics<parallel>, #tpu.dimension_semantics<arbitrary>], iteration_bounds = array<i64: 1, 1>, scalar_prefetch = 0 : i64, scratch_operands = 1 : i64, tpu.core_type = #tpu.core_type<tc>, window_params = [{transform_indices = @transform_0, window_bounds = array<i64: 32, 128>}, {transform_indices = @transform_1, window_bounds = array<i64: 128, 256>}, {transform_indices = @transform_2, window_bounds = array<i64: 1, 256>}, {transform_indices = @transform_3, window_bounds = array<i64: 256, 128>}, {pipeline_mode = #tpu.pipeline_mode<synchronous>, transform_indices = @transform_4, window_bounds = array<i64: 1, 128>}, {pipeline_mode = #tpu.pipeline_mode<synchronous>, transform_indices = @transform_5, window_bounds = array<i64: 1, 128>}, {pipeline_mode = #tpu.pipeline_mode<synchronous>, transform_indices = @transform_6, window_bounds = array<i64: 1, 128>}, {transform_indices = @transform_7, window_bounds = array<i64: 32, 128>}]} {
    %c0_i32 = arith.constant 0 : i32
    %0 = arith.cmpi eq, %arg1, %c0_i32 : i32
    %1 = arith.extui %0 : i1 to i32
    %c0_i32_0 = arith.constant 0 : i32
    %2 = arith.cmpi ne, %1, %c0_i32_0 : i32
    scf.if %2 {
      %cst_19 = arith.constant 0.000000e+00 : f32
      %31 = vector.broadcast %cst_19 : f32 to vector<32x128xf32>
      %c0_20 = arith.constant 0 : index
      %c0_21 = arith.constant 0 : index
      %32 = vector.load %arg10[%c0_20, %c0_21] : memref<32x128xf32, #tpu.memory_space<vmem>>, vector<32x128xf32>
      tpu.vector_store %arg10[%c0_20, %c0_21], %31 {strides = array<i32>} : memref<32x128xf32, #tpu.memory_space<vmem>>, vector<32x128xf32>,
    } else {
    }
    %c0 = arith.constant 0 : index
    %c0_1 = arith.constant 0 : index
    %3 = vector.load %arg2[%c0, %c0_1] : memref<32x128xbf16, #tpu.memory_space<vmem>>, vector<32x128xbf16>
    %c0_2 = arith.constant 0 : index
    %c0_3 = arith.constant 0 : index
    %4 = vector.load %arg3[%c0_2, %c0_3] : memref<128x256xbf16, #tpu.memory_space<vmem>>, vector<128x256xbf16>
    %cst = arith.constant dense<0.000000e+00> : vector<32x256xf32>
    %5 = tpu.matmul %3, %4, %cst {dimension_numbers = #tpu.dot_dimension_numbers<[1], [0], [0], [1], [0, 0, 1, 1], [], []>} : vector<32x128xbf16>, vector<128x256xbf16>, vector<32x256xf32> -> vector<32x256xf32>
    %c0_4 = arith.constant 0 : index
    %c0_5 = arith.constant 0 : index
    %6 = vector.load %arg4[%c0_4, %c0_5] : memref<1x256xf32, #tpu.memory_space<vmem>>, vector<1x256xf32>
    %7 = vector.broadcast %6 : vector<1x256xf32> to vector<32x256xf32>
    %8 = arith.addf %5, %7 : vector<32x256xf32>
    %9 = arith.mulf %8, %8 : vector<32x256xf32>
    %10 = arith.mulf %8, %9 : vector<32x256xf32>
    %cst_6 = arith.constant 4.471500e-02 : f32
    %11 = vector.broadcast %cst_6 : f32 to vector<32x256xf32>
    %12 = arith.mulf %11, %10 : vector<32x256xf32>
    %13 = arith.addf %8, %12 : vector<32x256xf32>
    %cst_7 = arith.constant 0.797884583 : f32
    %14 = vector.broadcast %cst_7 : f32 to vector<32x256xf32>
    %15 = arith.mulf %14, %13 : vector<32x256xf32>
    %16 = math.tanh %15 : vector<32x256xf32>
    %cst_8 = arith.constant 1.000000e+00 : f32
    %17 = vector.broadcast %cst_8 : f32 to vector<32x256xf32>
    %18 = arith.addf %17, %16 : vector<32x256xf32>
    %cst_9 = arith.constant 5.000000e-01 : f32
    %19 = vector.broadcast %cst_9 : f32 to vector<32x256xf32>
    %20 = arith.mulf %19, %18 : vector<32x256xf32>
    %21 = arith.mulf %8, %20 : vector<32x256xf32>
    %c0_10 = arith.constant 0 : index
    %c0_11 = arith.constant 0 : index
    %22 = vector.load %arg10[%c0_10, %c0_11] : memref<32x128xf32, #tpu.memory_space<vmem>>, vector<32x128xf32>
    %23 = arith.truncf %21 : vector<32x256xf32> to vector<32x256xbf16>
    %c0_12 = arith.constant 0 : index
    %c0_13 = arith.constant 0 : index
    %24 = vector.load %arg5[%c0_12, %c0_13] : memref<256x128xbf16, #tpu.memory_space<vmem>>, vector<256x128xbf16>
    %cst_14 = arith.constant dense<0.000000e+00> : vector<32x128xf32>
    %25 = tpu.matmul %23, %24, %cst_14 {dimension_numbers = #tpu.dot_dimension_numbers<[1], [0], [0], [1], [0, 0, 1, 1], [], []>} : vector<32x256xbf16>, vector<256x128xbf16>, vector<32x128xf32> -> vector<32x128xf32>
    %26 = arith.addf %22, %25 : vector<32x128xf32>
    %c0_15 = arith.constant 0 : index
    %c0_16 = arith.constant 0 : index
    %27 = vector.load %arg10[%c0_15, %c0_16] : memref<32x128xf32, #tpu.memory_space<vmem>>, vector<32x128xf32>
    tpu.vector_store %arg10[%c0_15, %c0_16], %26 {strides = array<i32>} : memref<32x128xf32, #tpu.memory_space<vmem>>, vector<32x128xf32>,
    %c0_i32_17 = arith.constant 0 : i32
    %28 = arith.cmpi eq, %arg1, %c0_i32_17 : i32
    %29 = arith.extui %28 : i1 to i32
    %c0_i32_18 = arith.constant 0 : i32
    %30 = arith.cmpi ne, %29, %c0_i32_18 : i32
    scf.if %30 {
      %c0_19 = arith.constant 0 : index
      %c0_20 = arith.constant 0 : index
      %31 = vector.load %arg10[%c0_19, %c0_20] : memref<32x128xf32, #tpu.memory_space<vmem>>, vector<32x128xf32>
      %c0_21 = arith.constant 0 : index
      %c0_22 = arith.constant 0 : index
      %32 = vector.load %arg6[%c0_21, %c0_22] : memref<1x128xf32, #tpu.memory_space<vmem>>, vector<1x128xf32>
      %33 = vector.broadcast %32 : vector<1x128xf32> to vector<32x128xf32>
      %34 = arith.addf %31, %33 : vector<32x128xf32>
      %c0_23 = arith.constant 0 : index
      %c0_24 = arith.constant 0 : index
      %35 = vector.load %arg2[%c0_23, %c0_24] : memref<32x128xbf16, #tpu.memory_space<vmem>>, vector<32x128xbf16>
      %36 = arith.extf %35 : vector<32x128xbf16> to vector<32x128xf32>
      %37 = arith.addf %34, %36 : vector<32x128xf32>
      %cst_25 = arith.constant dense<0.000000e+00> : vector<32xf32>
      %38 = vector.multi_reduction <add>, %37, %cst_25 [1] : vector<32x128xf32> to vector<32xf32>
      %39 = vector.shape_cast %38 : vector<32xf32> to vector<32x1xf32>
      %cst_26 = arith.constant 1.280000e+02 : f32
      %40 = vector.broadcast %cst_26 : f32 to vector<32x1xf32>
      %41 = arith.divf %39, %40 : vector<32x1xf32>
      %42 = vector.broadcast %41 : vector<32x1xf32> to vector<32x128xf32>
      %43 = arith.subf %37, %42 : vector<32x128xf32>
      %44 = arith.mulf %43, %43 : vector<32x128xf32>
      %cst_27 = arith.constant dense<0.000000e+00> : vector<32xf32>
      %45 = vector.multi_reduction <add>, %44, %cst_27 [1] : vector<32x128xf32> to vector<32xf32>
      %46 = vector.shape_cast %45 : vector<32xf32> to vector<32x1xf32>
      %cst_28 = arith.constant 1.280000e+02 : f32
      %47 = vector.broadcast %cst_28 : f32 to vector<32x1xf32>
      %48 = arith.divf %46, %47 : vector<32x1xf32>
      %cst_29 = arith.constant 9.99999996E-13 : f32
      %49 = vector.broadcast %cst_29 : f32 to vector<32x1xf32>
      %50 = arith.addf %48, %49 : vector<32x1xf32>
      %51 = math.rsqrt %50 : vector<32x1xf32>
      %52 = vector.broadcast %41 : vector<32x1xf32> to vector<32x128xf32>
      %53 = arith.subf %37, %52 : vector<32x128xf32>
      %54 = vector.broadcast %51 : vector<32x1xf32> to vector<32x128xf32>
      %55 = arith.mulf %53, %54 : vector<32x128xf32>
      %c0_30 = arith.constant 0 : index
      %c0_31 = arith.constant 0 : index
      %56 = vector.load %arg7[%c0_30, %c0_31] : memref<1x128xf32, #tpu.memory_space<vmem>>, vector<1x128xf32>
      %57 = vector.broadcast %56 : vector<1x128xf32> to vector<32x128xf32>
      %58 = arith.mulf %55, %57 : vector<32x128xf32>
      %c0_32 = arith.constant 0 : index
      %c0_33 = arith.constant 0 : index
      %59 = vector.load %arg8[%c0_32, %c0_33] : memref<1x128xf32, #tpu.memory_space<vmem>>, vector<1x128xf32>
      %60 = vector.broadcast %59 : vector<1x128xf32> to vector<32x128xf32>
      %61 = arith.addf %58, %60 : vector<32x128xf32>
      %62 = arith.truncf %61 : vector<32x128xf32> to vector<32x128xbf16>
      %c0_34 = arith.constant 0 : index
      %c0_35 = arith.constant 0 : index
      %63 = vector.load %arg9[%c0_34, %c0_35] : memref<32x128xbf16, #tpu.memory_space<vmem>>, vector<32x128xbf16>
      tpu.vector_store %arg9[%c0_34, %c0_35], %62 {strides = array<i32>} : memref<32x128xbf16, #tpu.memory_space<vmem>>, vector<32x128xbf16>,
    } else {
    }
    return
  }
  func.func @transform_0(%arg0: i32, %arg1: i32) -> (i32, i32) {
    %c0_i32 = arith.constant 0 : i32
    %c0_i32_0 = arith.constant 0 : i32
    return %arg0, %c0_i32 : i32, i32
  }
  func.func @transform_1(%arg0: i32, %arg1: i32) -> (i32, i32) {
    %c0_i32 = arith.constant 0 : i32
    %c0_i32_0 = arith.constant 0 : i32
    return %c0_i32, %arg1 : i32, i32
  }
  func.func @transform_2(%arg0: i32, %arg1: i32) -> (i32, i32) {
    %c0_i32 = arith.constant 0 : i32
    %c0_i32_0 = arith.constant 0 : i32
    return %c0_i32, %arg1 : i32, i32
  }
  func.func @transform_3(%arg0: i32, %arg1: i32) -> (i32, i32) {
    %c0_i32 = arith.constant 0 : i32
    %c0_i32_0 = arith.constant 0 : i32
    return %arg1, %c0_i32 : i32, i32
  }
  func.func @transform_4(%arg0: i32, %arg1: i32) -> (i32, i32) {
    %c0_i32 = arith.constant 0 : i32
    %c0_i32_0 = arith.constant 0 : i32
    %c0_i32_1 = arith.constant 0 : i32
    return %c0_i32, %c0_i32_0 : i32, i32
  }
  func.func @transform_5(%arg0: i32, %arg1: i32) -> (i32, i32) {
    %c0_i32 = arith.constant 0 : i32
    %c0_i32_0 = arith.constant 0 : i32
    %c0_i32_1 = arith.constant 0 : i32
    return %c0_i32, %c0_i32_0 : i32, i32
  }
  func.func @transform_6(%arg0: i32, %arg1: i32) -> (i32, i32) {
    %c0_i32 = arith.constant 0 : i32
    %c0_i32_0 = arith.constant 0 : i32
    %c0_i32_1 = arith.constant 0 : i32
    return %c0_i32, %c0_i32_0 : i32, i32
  }
  func.func @transform_7(%arg0: i32, %arg1: i32) -> (i32, i32) {
    %c0_i32 = arith.constant 0 : i32
    %c0_i32_0 = arith.constant 0 : i32
    return %arg0, %c0_i32 : i32, i32
  }
}

module attributes {stable_mosaic.version = 11 : i64} {
  func.func @kernel(%arg0: i32, %arg1: i32, %arg2: i32, %arg3: memref<2x128xbf16, #tpu.memory_space<vmem>>, %arg4: memref<128x128xbf16, #tpu.memory_space<vmem>>, %arg5: memref<1x128xf32, #tpu.memory_space<vmem>>, %arg6: memref<2x128xf32, #tpu.memory_space<vmem>>, %arg7: memref<2x128xf32, #tpu.memory_space<vmem>>) attributes {dimension_semantics = [#tpu.dimension_semantics<parallel>, #tpu.dimension_semantics<parallel>, #tpu.dimension_semantics<arbitrary>], iteration_bounds = array<i64: 1, 1, 1>, scalar_prefetch = 0 : i64, scratch_operands = 1 : i64, tpu.core_type = #tpu.core_type<tc>, window_params = [{transform_indices = @transform_0, window_bounds = array<i64: 2, 128>}, {transform_indices = @transform_1, window_bounds = array<i64: 128, 128>}, {transform_indices = @transform_2, window_bounds = array<i64: 1, 128>}, {transform_indices = @transform_3, window_bounds = array<i64: 2, 128>}]} {
    %c0_i32 = arith.constant 0 : i32
    %0 = arith.cmpi eq, %arg2, %c0_i32 : i32
    %1 = arith.extui %0 : i1 to i32
    %c0_i32_0 = arith.constant 0 : i32
    %2 = arith.cmpi ne, %1, %c0_i32_0 : i32
    scf.if %2 {
      %cst_10 = arith.constant 0.000000e+00 : f32
      %12 = vector.broadcast %cst_10 : f32 to vector<2x128xf32>
      %c0_11 = arith.constant 0 : index
      %c0_12 = arith.constant 0 : index
      %13 = vector.load %arg7[%c0_11, %c0_12] : memref<2x128xf32, #tpu.memory_space<vmem>>, vector<2x128xf32>
      tpu.vector_store %arg7[%c0_11, %c0_12], %12 {strides = array<i32>} : memref<2x128xf32, #tpu.memory_space<vmem>>, vector<2x128xf32>,
    } else {
    }
    %c0 = arith.constant 0 : index
    %c0_1 = arith.constant 0 : index
    %3 = vector.load %arg7[%c0, %c0_1] : memref<2x128xf32, #tpu.memory_space<vmem>>, vector<2x128xf32>
    %c0_2 = arith.constant 0 : index
    %c0_3 = arith.constant 0 : index
    %4 = vector.load %arg3[%c0_2, %c0_3] : memref<2x128xbf16, #tpu.memory_space<vmem>>, vector<2x128xbf16>
    %c0_4 = arith.constant 0 : index
    %c0_5 = arith.constant 0 : index
    %5 = vector.load %arg4[%c0_4, %c0_5] : memref<128x128xbf16, #tpu.memory_space<vmem>>, vector<128x128xbf16>
    %cst = arith.constant dense<0.000000e+00> : vector<2x128xf32>
    %6 = tpu.matmul %4, %5, %cst {dimension_numbers = #tpu.dot_dimension_numbers<[1], [0], [0], [1], [0, 0, 1, 1], [], []>} : vector<2x128xbf16>, vector<128x128xbf16>, vector<2x128xf32> -> vector<2x128xf32>
    %7 = arith.addf %3, %6 : vector<2x128xf32>
    %c0_6 = arith.constant 0 : index
    %c0_7 = arith.constant 0 : index
    %8 = vector.load %arg7[%c0_6, %c0_7] : memref<2x128xf32, #tpu.memory_space<vmem>>, vector<2x128xf32>
    tpu.vector_store %arg7[%c0_6, %c0_7], %7 {strides = array<i32>} : memref<2x128xf32, #tpu.memory_space<vmem>>, vector<2x128xf32>,
    %c0_i32_8 = arith.constant 0 : i32
    %9 = arith.cmpi eq, %arg2, %c0_i32_8 : i32
    %10 = arith.extui %9 : i1 to i32
    %c0_i32_9 = arith.constant 0 : i32
    %11 = arith.cmpi ne, %10, %c0_i32_9 : i32
    scf.if %11 {
      %c0_10 = arith.constant 0 : index
      %c0_11 = arith.constant 0 : index
      %12 = vector.load %arg7[%c0_10, %c0_11] : memref<2x128xf32, #tpu.memory_space<vmem>>, vector<2x128xf32>
      %c0_12 = arith.constant 0 : index
      %c0_13 = arith.constant 0 : index
      %13 = vector.load %arg5[%c0_12, %c0_13] : memref<1x128xf32, #tpu.memory_space<vmem>>, vector<1x128xf32>
      %14 = vector.broadcast %13 : vector<1x128xf32> to vector<2x128xf32>
      %15 = arith.addf %12, %14 : vector<2x128xf32>
      %c0_14 = arith.constant 0 : index
      %c0_15 = arith.constant 0 : index
      %16 = vector.load %arg6[%c0_14, %c0_15] : memref<2x128xf32, #tpu.memory_space<vmem>>, vector<2x128xf32>
      tpu.vector_store %arg6[%c0_14, %c0_15], %15 {strides = array<i32>} : memref<2x128xf32, #tpu.memory_space<vmem>>, vector<2x128xf32>,
    } else {
    }
    return
  }
  func.func @transform_0(%arg0: i32, %arg1: i32, %arg2: i32) -> (i32, i32) {
    %c0_i32 = arith.constant 0 : i32
    return %arg0, %arg2 : i32, i32
  }
  func.func @transform_1(%arg0: i32, %arg1: i32, %arg2: i32) -> (i32, i32) {
    %c0_i32 = arith.constant 0 : i32
    return %arg2, %arg1 : i32, i32
  }
  func.func @transform_2(%arg0: i32, %arg1: i32, %arg2: i32) -> (i32, i32) {
    %c0_i32 = arith.constant 0 : i32
    %c0_i32_0 = arith.constant 0 : i32
    return %c0_i32, %arg1 : i32, i32
  }
  func.func @transform_3(%arg0: i32, %arg1: i32, %arg2: i32) -> (i32, i32) {
    %c0_i32 = arith.constant 0 : i32
    return %arg0, %arg1 : i32, i32
  }
}

module attributes {stable_mosaic.version = 11 : i64} {
  func.func @kernel(%arg0: i32, %arg1: i32, %arg2: i32, %arg3: memref<2x128xbf16, #tpu.memory_space<vmem>>, %arg4: memref<128x128xbf16, #tpu.memory_space<vmem>>, %arg5: memref<1x128xf32, #tpu.memory_space<vmem>>, %arg6: memref<2x128xbf16, #tpu.memory_space<vmem>>, %arg7: memref<2x128xf32, #tpu.memory_space<vmem>>) attributes {dimension_semantics = [#tpu.dimension_semantics<parallel>, #tpu.dimension_semantics<parallel>, #tpu.dimension_semantics<arbitrary>], iteration_bounds = array<i64: 1, 1, 1>, scalar_prefetch = 0 : i64, scratch_operands = 1 : i64, tpu.core_type = #tpu.core_type<tc>, window_params = [{transform_indices = @transform_0, window_bounds = array<i64: 2, 128>}, {transform_indices = @transform_1, window_bounds = array<i64: 128, 128>}, {transform_indices = @transform_2, window_bounds = array<i64: 1, 128>}, {transform_indices = @transform_3, window_bounds = array<i64: 2, 128>}]} {
    %c0_i32 = arith.constant 0 : i32
    %0 = arith.cmpi eq, %arg2, %c0_i32 : i32
    %1 = arith.extui %0 : i1 to i32
    %c0_i32_0 = arith.constant 0 : i32
    %2 = arith.cmpi ne, %1, %c0_i32_0 : i32
    scf.if %2 {
      %cst_10 = arith.constant 0.000000e+00 : f32
      %12 = vector.broadcast %cst_10 : f32 to vector<2x128xf32>
      %c0_11 = arith.constant 0 : index
      %c0_12 = arith.constant 0 : index
      %13 = vector.load %arg7[%c0_11, %c0_12] : memref<2x128xf32, #tpu.memory_space<vmem>>, vector<2x128xf32>
      tpu.vector_store %arg7[%c0_11, %c0_12], %12 {strides = array<i32>} : memref<2x128xf32, #tpu.memory_space<vmem>>, vector<2x128xf32>,
    } else {
    }
    %c0 = arith.constant 0 : index
    %c0_1 = arith.constant 0 : index
    %3 = vector.load %arg7[%c0, %c0_1] : memref<2x128xf32, #tpu.memory_space<vmem>>, vector<2x128xf32>
    %c0_2 = arith.constant 0 : index
    %c0_3 = arith.constant 0 : index
    %4 = vector.load %arg3[%c0_2, %c0_3] : memref<2x128xbf16, #tpu.memory_space<vmem>>, vector<2x128xbf16>
    %c0_4 = arith.constant 0 : index
    %c0_5 = arith.constant 0 : index
    %5 = vector.load %arg4[%c0_4, %c0_5] : memref<128x128xbf16, #tpu.memory_space<vmem>>, vector<128x128xbf16>
    %cst = arith.constant dense<0.000000e+00> : vector<2x128xf32>
    %6 = tpu.matmul %4, %5, %cst {dimension_numbers = #tpu.dot_dimension_numbers<[1], [0], [0], [1], [0, 0, 1, 1], [], []>} : vector<2x128xbf16>, vector<128x128xbf16>, vector<2x128xf32> -> vector<2x128xf32>
    %7 = arith.addf %3, %6 : vector<2x128xf32>
    %c0_6 = arith.constant 0 : index
    %c0_7 = arith.constant 0 : index
    %8 = vector.load %arg7[%c0_6, %c0_7] : memref<2x128xf32, #tpu.memory_space<vmem>>, vector<2x128xf32>
    tpu.vector_store %arg7[%c0_6, %c0_7], %7 {strides = array<i32>} : memref<2x128xf32, #tpu.memory_space<vmem>>, vector<2x128xf32>,
    %c0_i32_8 = arith.constant 0 : i32
    %9 = arith.cmpi eq, %arg2, %c0_i32_8 : i32
    %10 = arith.extui %9 : i1 to i32
    %c0_i32_9 = arith.constant 0 : i32
    %11 = arith.cmpi ne, %10, %c0_i32_9 : i32
    scf.if %11 {
      %c0_10 = arith.constant 0 : index
      %c0_11 = arith.constant 0 : index
      %12 = vector.load %arg7[%c0_10, %c0_11] : memref<2x128xf32, #tpu.memory_space<vmem>>, vector<2x128xf32>
      %c0_12 = arith.constant 0 : index
      %c0_13 = arith.constant 0 : index
      %13 = vector.load %arg5[%c0_12, %c0_13] : memref<1x128xf32, #tpu.memory_space<vmem>>, vector<1x128xf32>
      %14 = vector.broadcast %13 : vector<1x128xf32> to vector<2x128xf32>
      %15 = arith.addf %12, %14 : vector<2x128xf32>
      %16 = math.tanh %15 : vector<2x128xf32>
      %17 = arith.truncf %16 : vector<2x128xf32> to vector<2x128xbf16>
      %c0_14 = arith.constant 0 : index
      %c0_15 = arith.constant 0 : index
      %18 = vector.load %arg6[%c0_14, %c0_15] : memref<2x128xbf16, #tpu.memory_space<vmem>>, vector<2x128xbf16>
      tpu.vector_store %arg6[%c0_14, %c0_15], %17 {strides = array<i32>} : memref<2x128xbf16, #tpu.memory_space<vmem>>, vector<2x128xbf16>,
    } else {
    }
    return
  }
  func.func @transform_0(%arg0: i32, %arg1: i32, %arg2: i32) -> (i32, i32) {
    %c0_i32 = arith.constant 0 : i32
    return %arg0, %arg2 : i32, i32
  }
  func.func @transform_1(%arg0: i32, %arg1: i32, %arg2: i32) -> (i32, i32) {
    %c0_i32 = arith.constant 0 : i32
    return %arg2, %arg1 : i32, i32
  }
  func.func @transform_2(%arg0: i32, %arg1: i32, %arg2: i32) -> (i32, i32) {
    %c0_i32 = arith.constant 0 : i32
    %c0_i32_0 = arith.constant 0 : i32
    return %c0_i32, %arg1 : i32, i32
  }
  func.func @transform_3(%arg0: i32, %arg1: i32, %arg2: i32) -> (i32, i32) {
    %c0_i32 = arith.constant 0 : i32
    return %arg0, %arg1 : i32, i32
  }
}

module attributes {stable_mosaic.version = 11 : i64} {
  func.func @kernel(%arg0: i32, %arg1: i32, %arg2: i32, %arg3: memref<32x128xbf16, #tpu.memory_space<vmem>>, %arg4: memref<128x128xbf16, #tpu.memory_space<vmem>>, %arg5: memref<1x128xf32, #tpu.memory_space<vmem>>, %arg6: memref<32x128xf32, #tpu.memory_space<vmem>>, %arg7: memref<32x128xf32, #tpu.memory_space<vmem>>) attributes {dimension_semantics = [#tpu.dimension_semantics<parallel>, #tpu.dimension_semantics<parallel>, #tpu.dimension_semantics<arbitrary>], iteration_bounds = array<i64: 1, 1, 1>, scalar_prefetch = 0 : i64, scratch_operands = 1 : i64, tpu.core_type = #tpu.core_type<tc>, window_params = [{transform_indices = @transform_0, window_bounds = array<i64: 32, 128>}, {transform_indices = @transform_1, window_bounds = array<i64: 128, 128>}, {transform_indices = @transform_2, window_bounds = array<i64: 1, 128>}, {transform_indices = @transform_3, window_bounds = array<i64: 32, 128>}]} {
    %c0_i32 = arith.constant 0 : i32
    %0 = arith.cmpi eq, %arg2, %c0_i32 : i32
    %1 = arith.extui %0 : i1 to i32
    %c0_i32_0 = arith.constant 0 : i32
    %2 = arith.cmpi ne, %1, %c0_i32_0 : i32
    scf.if %2 {
      %cst_10 = arith.constant 0.000000e+00 : f32
      %12 = vector.broadcast %cst_10 : f32 to vector<32x128xf32>
      %c0_11 = arith.constant 0 : index
      %c0_12 = arith.constant 0 : index
      %13 = vector.load %arg7[%c0_11, %c0_12] : memref<32x128xf32, #tpu.memory_space<vmem>>, vector<32x128xf32>
      tpu.vector_store %arg7[%c0_11, %c0_12], %12 {strides = array<i32>} : memref<32x128xf32, #tpu.memory_space<vmem>>, vector<32x128xf32>,
    } else {
    }
    %c0 = arith.constant 0 : index
    %c0_1 = arith.constant 0 : index
    %3 = vector.load %arg7[%c0, %c0_1] : memref<32x128xf32, #tpu.memory_space<vmem>>, vector<32x128xf32>
    %c0_2 = arith.constant 0 : index
    %c0_3 = arith.constant 0 : index
    %4 = vector.load %arg3[%c0_2, %c0_3] : memref<32x128xbf16, #tpu.memory_space<vmem>>, vector<32x128xbf16>
    %c0_4 = arith.constant 0 : index
    %c0_5 = arith.constant 0 : index
    %5 = vector.load %arg4[%c0_4, %c0_5] : memref<128x128xbf16, #tpu.memory_space<vmem>>, vector<128x128xbf16>
    %cst = arith.constant dense<0.000000e+00> : vector<32x128xf32>
    %6 = tpu.matmul %4, %5, %cst {dimension_numbers = #tpu.dot_dimension_numbers<[1], [0], [0], [1], [0, 0, 1, 1], [], []>} : vector<32x128xbf16>, vector<128x128xbf16>, vector<32x128xf32> -> vector<32x128xf32>
    %7 = arith.addf %3, %6 : vector<32x128xf32>
    %c0_6 = arith.constant 0 : index
    %c0_7 = arith.constant 0 : index
    %8 = vector.load %arg7[%c0_6, %c0_7] : memref<32x128xf32, #tpu.memory_space<vmem>>, vector<32x128xf32>
    tpu.vector_store %arg7[%c0_6, %c0_7], %7 {strides = array<i32>} : memref<32x128xf32, #tpu.memory_space<vmem>>, vector<32x128xf32>,
    %c0_i32_8 = arith.constant 0 : i32
    %9 = arith.cmpi eq, %arg2, %c0_i32_8 : i32
    %10 = arith.extui %9 : i1 to i32
    %c0_i32_9 = arith.constant 0 : i32
    %11 = arith.cmpi ne, %10, %c0_i32_9 : i32
    scf.if %11 {
      %c0_10 = arith.constant 0 : index
      %c0_11 = arith.constant 0 : index
      %12 = vector.load %arg7[%c0_10, %c0_11] : memref<32x128xf32, #tpu.memory_space<vmem>>, vector<32x128xf32>
      %c0_12 = arith.constant 0 : index
      %c0_13 = arith.constant 0 : index
      %13 = vector.load %arg5[%c0_12, %c0_13] : memref<1x128xf32, #tpu.memory_space<vmem>>, vector<1x128xf32>
      %14 = vector.broadcast %13 : vector<1x128xf32> to vector<32x128xf32>
      %15 = arith.addf %12, %14 : vector<32x128xf32>
      %c0_14 = arith.constant 0 : index
      %c0_15 = arith.constant 0 : index
      %16 = vector.load %arg6[%c0_14, %c0_15] : memref<32x128xf32, #tpu.memory_space<vmem>>, vector<32x128xf32>
      tpu.vector_store %arg6[%c0_14, %c0_15], %15 {strides = array<i32>} : memref<32x128xf32, #tpu.memory_space<vmem>>, vector<32x128xf32>,
    } else {
    }
    return
  }
  func.func @transform_0(%arg0: i32, %arg1: i32, %arg2: i32) -> (i32, i32) {
    %c0_i32 = arith.constant 0 : i32
    return %arg0, %arg2 : i32, i32
  }
  func.func @transform_1(%arg0: i32, %arg1: i32, %arg2: i32) -> (i32, i32) {
    %c0_i32 = arith.constant 0 : i32
    return %arg2, %arg1 : i32, i32
  }
  func.func @transform_2(%arg0: i32, %arg1: i32, %arg2: i32) -> (i32, i32) {
    %c0_i32 = arith.constant 0 : i32
    %c0_i32_0 = arith.constant 0 : i32
    return %c0_i32, %arg1 : i32, i32
  }
  func.func @transform_3(%arg0: i32, %arg1: i32, %arg2: i32) -> (i32, i32) {
    %c0_i32 = arith.constant 0 : i32
    return %arg0, %arg1 : i32, i32
  }
}

</mosaic_0001>

<bundles_post_ra>
// kernel: bert_ner_forward.12
= control target key start
LH: loop header
LB: loop body
LE: loop exit
PB: predicated region body
PF: predicated region fallthrough
CT: control target
= control target key end

     0   :  { %s526_s15 = smov 0   ;;  %s528_s16 = smov 0   ;;  %s578_s0 = inlined_call_operand.vmem [shape: bf16[2,16,128], index: 0, kind: input, shape index: {}]   ;;  %s579_s1 = inlined_call_operand.vmem [shape: f32[16,128], index: 1, kind: input, shape index: {}]   ;;  %s580_s2 = inlined_call_operand.vmem [shape: f32[1,128], index: 2, kind: input, shape index: {}]   ;;  %s581_s3 = inlined_call_operand.vmem [shape: f32[1,128], index: 3, kind: input, shape index: {}]   ;;  %s582_s4 = inlined_call_operand.vmem [shape: bf16[2,16,128], index: 4, kind: output, shape index: {}]  }
   0x1   :  { %s530_s17 = smov 0  }
   0x2 LB: > { %s26_s18 = sadd.s32 1, %s495_s16  ;;  %p425_p0 = scmp.ge.s32.totalorder %s499_s17, 1  ;;  %s499_s17 = sphi %s530_s17, %s14_s17   ;;  %s495_s16 = sphi %s528_s16, %s584_s16   ;;  %s491_s15 = sphi %s526_s15, %s583_s15  }
   0x3   : > { %p28_p1 = scmp.ge.s32.totalorder %s26_s18, 2  ;;  %p194_p2 = scmp.lt.s32.totalorder %s499_s17, 3 }
   0x5   : > { %s586_s18 = smov (%p28_p1, %s26_s18), 0  ;;  %p195_p3 = pnand %p425_p0, %p194_p2 }
   0x6   : > { %p234_p4 = scmp.lt.s32.totalorder (!%p195_p3), %s491_s15, 1  ;;  %v263_v1 = vld [vmem:[%s579_s1] sm:$0xff] (!%p195_p3)  ;;  %v264_v4 = vld [vmem:[%s579_s1 + $0x8] sm:$0xff] (!%p195_p3) }
   0x7   : > { %198 = sbr.rel (%p195_p3) target bundleno = 340 (0x154), region = 36  ;;  %v430_v23 = vld [vmem:[%s580_s2] ss:$0 sm:$0xff] (!%p195_p3) }
   0x8   : > { %v431_v27 = vld [vmem:[%s581_s3] ss:$0 sm:$0xff] (!%p195_p3) }
   0xe   : > { %s588_s15 = smov (!%p234_p4, %s491_s15), 1 }
   0xf   : > { %s436_s19 = sshll.u32 %s588_s15, 3 }
  0x10   : > { %s241_s22 = scalar_lea.vmem %s578_s0, %s436_s19  ;;  %s257_s7 = scalar_lea.vmem %s582_s4, %s436_s19 }
  0x11   : > { %v441_v0 = vld [vmem:[%s241_s22] sm:$0xff]  }
  0x12   : > { %v442_v2 = vunpack.c.l.bf16 %v441_v0  ;;  %v443_v3 = vunpack.c.h.bf16 %v441_v0 }
  0x14   : > { %v265_v5 = vadd.f32 %v442_v2, %v263_v1  ;;  %v266_v6 = vadd.f32 %v443_v3, %v264_v4 }
  0x16   : > { %267 = vadd.xlane.f32.xlu0 %v265_v5 }
  0x1a   : > { %269 = vadd.xlane.f32.xlu0 %v266_v6 }
  0xa3   : > { %v268_v7 = vpop.xlane.xlu0 %267 }
  0xa4   : > { %v272_v8 = vmul.f32 0.0078125, %v268_v7 }
  0xa6   : > { %v274_v9 = vsub.f32 %v265_v5, %v272_v8 }
  0xa7   : > { %v270_v10 = vpop.xlane.xlu0 %269 }
  0xa8   : > { %v273_v11 = vmul.f32 0.0078125, %v270_v10  ;;  %v276_v12 = vmul.f32 %v274_v9, %v274_v9 }
  0xaa   : > { %v275_v13 = vsub.f32 %v266_v6, %v273_v11  ;;  %278 = vadd.xlane.f32.xlu1 %v276_v12 }
  0xac   : > { %v277_v14 = vmul.f32 %v275_v13, %v275_v13 }
  0xae   : > { %280 = vadd.xlane.f32.xlu1 %v277_v14 }
 0x137   : > { %v279_v15 = vpop.xlane.xlu1 %278 }
 0x138   : > { %v282_v16 = vmul.f32 0.0078125, %v279_v15 }
 0x13a   : > { %v284_v17 = vadd.f32 1e-12, %v282_v16 }
 0x13b   : > { %v281_v18 = vpop.xlane.xlu1 %280 }
 0x13c   : > { %473 = vrsqrt.f32 %v284_v17  ;;  %v283_v19 = vmul.f32 0.0078125, %v281_v18 }
 0x13e   : > { %v285_v20 = vadd.f32 1e-12, %v283_v19 }
 0x140   : > { %475 = vrsqrt.f32 %v285_v20 }
 0x146   : > { %v474_v21 = vpop.eup %473 }
 0x147   : > { %v288_v22 = vmul.f32 %v474_v21, %v274_v9 }
 0x149   : > { %v297_v25 = vmul.f32 %v430_v23, %v288_v22 }
 0x14a   : > { %v476_v24 = vpop.eup %475 }
 0x14b   : > { %v289_v26 = vmul.f32 %v476_v24, %v275_v13  ;;  %v306_v29 = vadd.f32 %v431_v27, %v297_v25 }
 0x14d   : > { %v298_v28 = vmul.f32 %v430_v23, %v289_v26 }
 0x14f   : > { %v307_v30 = vadd.f32 %v431_v27, %v298_v28 }
 0x151   : > { %v447_v31 = vpack.c.bf16 %v307_v30, %v306_v29 }
 0x153   : > { %448 = vst [vmem:[%s257_s7] sm:$0xff] %v447_v31  }
 0x154 PF: > { %s14_s17 = sadd.s32 1, %s499_s17   ;;  %s583_s15 = smov %s495_s16 }
 0x155   : > { %p11_p5 = scmp.ge.s32.totalorder %s14_s17, 4   ;;  %s584_s16 = smov %s586_s18 }
 0x157   :  { %13 = sbr.rel (!%p11_p5) target bundleno = 2 (0x2), region = 69 }

// kernel: bert_ner_forward.15
= control target key start
LH: loop header
LB: loop body
LE: loop exit
PB: predicated region body
PF: predicated region fallthrough
CT: control target
= control target key end

     0   :  { %s469_s1 = inlined_call_operand.vmem [shape: bf16[128,128], index: 1, kind: input, shape index: {}]   ;;  %s470_s0 = inlined_call_operand.vmem [shape: bf16[32,128], index: 0, kind: input, shape index: {}]   ;;  %s471_s3 = inlined_call_operand.vmem [shape: bf16[32,128], index: 3, kind: input, shape index: {}]   ;;  %s472_s2 = inlined_call_operand.vmem [shape: f32[1,128], index: 2, kind: input, shape index: {}]   ;;  %s473_s4 = inlined_call_operand.vmem [shape: f32[1,128], index: 4, kind: input, shape index: {}]   ;;  %s474_s5 = inlined_call_operand.vmem [shape: f32[1,128], index: 5, kind: input, shape index: {}]   ;;  %s475_s6 = inlined_call_operand.vmem [shape: bf16[32,128], index: 6, kind: output, shape index: {}]  }
   0x1   :  { %v365_v0 = vld [vmem:[%s469_s1] sm:$0xff]   ;;  %v366_v1 = vld [vmem:[%s469_s1 + $0x8] sm:$0xff]   ;;  %v367_v2 = vld [vmem:[%s469_s1 + $0x10] sm:$0xff]  }
   0x2   :  { %345 = vmatprep.subr.bf16.mxu0 %v365_v0  ;;  %v368_v3 = vld [vmem:[%s469_s1 + $0x18] sm:$0xff]   ;;  %v373_v4 = vld [vmem:[%s470_s0] sm:$0xff]   ;;  %v370_v6 = vld [vmem:[%s469_s1 + $0x28] sm:$0xff]  }
   0x3   :  { %346 = vmatpush3.bf16.msra.mxu0 %v365_v0  ;;  %361 = vmatprep.mubr.bf16.mxu0 %v373_v4  ;;  %v369_v5 = vld [vmem:[%s469_s1 + $0x20] sm:$0xff]   ;;  %v371_v7 = vld [vmem:[%s469_s1 + $0x30] sm:$0xff]   ;;  %v372_v8 = vld [vmem:[%s469_s1 + $0x38] sm:$0xff]  }
   0x4   :  { %347 = vmatprep.subr.bf16.mxu0 %v366_v1  ;;  %v374_v9 = vld [vmem:[%s470_s0 + $0x8] sm:$0xff]   ;;  %v316_v11 = vld [vmem:[%s471_s3] sm:$0xff]  }
   0x5   :  { %v333_v10 = vld [vmem:[%s471_s3 + $0x8] sm:$0xff]   ;;  %v304_v12 = vld [vmem:[%s472_s2] ss:$0 sm:$0xff]  ;;  %v317_v15 = vunpack.c.l.bf16 %v316_v11  ;;  %v318_v26 = vunpack.c.h.bf16 %v316_v11 }
   0x6   :  { %v321_v13 = vunpack.c.l.bf16 %v333_v10  ;;  %v322_v23 = vunpack.c.h.bf16 %v333_v10  ;;  %v305_v59 = vld [vmem:[%s473_s4] ss:$0 sm:$0xff] }
   0x7   :  { %348 = vmatpush3.bf16.msra.mxu0 %v366_v1  ;;  %v306_v0 = vld [vmem:[%s474_s5] ss:$0 sm:$0xff] }
   0x8   :  { %349 = vmatprep.subr.bf16.mxu0 %v367_v2 }
   0xb   :  { %350 = vmatpush3.bf16.msra.mxu0 %v367_v2 }
   0xc   :  { %351 = vmatprep.subr.bf16.mxu0 %v368_v3 }
   0xf   :  { %352 = vmatpush3.bf16.msra.mxu0 %v368_v3 }
  0x10   :  { %353 = vmatprep.subr.bf16.mxu0 %v369_v5 }
  0x13   :  { %354 = vmatpush3.bf16.msra.mxu0 %v369_v5 }
  0x14   :  { %355 = vmatprep.subr.bf16.mxu0 %v370_v6 }
  0x17   :  { %356 = vmatpush3.bf16.msra.mxu0 %v370_v6 }
  0x18   :  { %357 = vmatprep.subr.bf16.mxu0 %v371_v7 }
  0x1b   :  { %358 = vmatpush3.bf16.msra.mxu0 %v371_v7 }
  0x1c   :  { %359 = vmatprep.subr.bf16.mxu0 %v372_v8 }
  0x1f   :  { %360 = vmatpush3.bf16.msra.mxu0 %v372_v8 }
  0x22   :  { %362 = vmatmul.mubr.bf16.vlgmr.msra.gmra.mrb[0].mxu0 %v374_v9 }
  0xf5   :  { %v363_v14 = vpop.f32.mrb[0].mxu0 }
  0xf6   :  { %v189_v16 = vadd.f32 %v363_v14, %v304_v12  ;;  %v150_v17 = vpop.f32.mrb[1].mxu0 }
  0xf7   :  { %v187_v18 = vadd.f32 %v304_v12, %v150_v17  ;;  %v364_v19 = vpop.f32.mrb[2].mxu0 }
  0xf8   :  { %v190_v20 = vadd.f32 %v364_v19, %v304_v12  ;;  %v153_v21 = vpop.f32.mrb[3].mxu0  ;;  %v201_v22 = vadd.f32 %v321_v13, %v189_v16 }
  0xf9   :  { %v188_v24 = vadd.f32 %v304_v12, %v153_v21  ;;  %v199_v25 = vadd.f32 %v317_v15, %v187_v18 }
  0xfa   :  { %207 = vadd.xlane.f32.xlu1 %v201_v22  ;;  %v202_v27 = vadd.f32 %v322_v23, %v190_v20 }
  0xfb   :  { %203 = vadd.xlane.f32.xlu0 %v199_v25  ;;  %v200_v28 = vadd.f32 %v318_v26, %v188_v24 }
  0xfe   :  { %209 = vadd.xlane.f32.xlu1 %v202_v27 }
  0xff   :  { %205 = vadd.xlane.f32.xlu0 %v200_v28 }
 0x187   :  { %v208_v29 = vpop.xlane.xlu1 %207 }
 0x188   :  { %v204_v30 = vpop.xlane.xlu0 %203  ;;  %v214_v31 = vmul.f32 0.0078125, %v208_v29 }
 0x189   :  { %v212_v32 = vmul.f32 0.0078125, %v204_v30 }
 0x18a   :  { %v218_v36 = vsub.f32 %v201_v22, %v214_v31 }
 0x18b   :  { %v216_v33 = vsub.f32 %v199_v25, %v212_v32  ;;  %v210_v34 = vpop.xlane.xlu1 %209 }
 0x18c   :  { %v206_v35 = vpop.xlane.xlu0 %205  ;;  %v215_v37 = vmul.f32 0.0078125, %v210_v34  ;;  %v222_v42 = vmul.f32 %v218_v36, %v218_v36 }
 0x18d   :  { %v213_v38 = vmul.f32 0.0078125, %v206_v35  ;;  %v220_v39 = vmul.f32 %v216_v33, %v216_v33 }
 0x18e   :  { %v219_v41 = vsub.f32 %v202_v27, %v215_v37 }
 0x18f   :  { %v217_v40 = vsub.f32 %v200_v28, %v213_v38  ;;  %224 = vadd.xlane.f32.xlu0 %v220_v39 }
 0x190   :  { %v223_v44 = vmul.f32 %v219_v41, %v219_v41 }
 0x191   :  { %v221_v43 = vmul.f32 %v217_v40, %v217_v40 }
 0x193   :  { %228 = vadd.xlane.f32.xlu0 %v222_v42  ;;  %226 = vadd.xlane.f32.xlu1 %v221_v43 }
 0x197   :  { %230 = vadd.xlane.f32.xlu1 %v223_v44 }
 0x21c   :  { %v225_v45 = vpop.xlane.xlu0 %224 }
 0x21d   :  { %v232_v46 = vmul.f32 0.0078125, %v225_v45 }
 0x21f   :  { %v236_v47 = vadd.f32 1e-12, %v232_v46 }
 0x220   :  { %v227_v48 = vpop.xlane.xlu1 %226  ;;  %v229_v49 = vpop.xlane.xlu0 %228 }
 0x221   :  { %375 = vrsqrt.f32 %v236_v47  ;;  %v233_v50 = vmul.f32 0.0078125, %v227_v48  ;;  %v234_v51 = vmul.f32 0.0078125, %v229_v49 }
 0x223   :  { %v237_v52 = vadd.f32 1e-12, %v233_v50  ;;  %v238_v53 = vadd.f32 1e-12, %v234_v51 }
 0x224   :  { %v231_v54 = vpop.xlane.xlu1 %230 }
 0x225   :  { %377 = vrsqrt.f32 %v237_v52  ;;  %v235_v55 = vmul.f32 0.0078125, %v231_v54 }
 0x226   :  { %379 = vrsqrt.f32 %v238_v53 }
 0x227   :  { %v239_v56 = vadd.f32 1e-12, %v235_v55 }
 0x229   :  { %381 = vrsqrt.f32 %v239_v56 }
 0x22b   :  { %v376_v57 = vpop.eup %375 }
 0x22c   :  { %v244_v58 = vmul.f32 %v376_v57, %v216_v33 }
 0x22e   :  { %v255_v62 = vmul.f32 %v305_v59, %v244_v58 }
 0x22f   :  { %v378_v60 = vpop.eup %377 }
 0x230   :  { %v380_v61 = vpop.eup %379  ;;  %v245_v63 = vmul.f32 %v378_v60, %v217_v40  ;;  %v266_v4 = vadd.f32 %v306_v0, %v255_v62 }
 0x231   :  { %v246_v1 = vmul.f32 %v380_v61, %v218_v36 }
 0x232   :  { %v256_v2 = vmul.f32 %v305_v59, %v245_v63 }
 0x233   :  { %v382_v3 = vpop.eup %381  ;;  %v257_v6 = vmul.f32 %v305_v59, %v246_v1 }
 0x234   :  { %v267_v5 = vadd.f32 %v306_v0, %v256_v2  ;;  %v247_v7 = vmul.f32 %v382_v3, %v219_v41 }
 0x235   :  { %v268_v10 = vadd.f32 %v306_v0, %v257_v6 }
 0x236   :  { %v326_v8 = vpack.c.bf16 %v267_v5, %v266_v4  ;;  %v258_v9 = vmul.f32 %v305_v59, %v247_v7 }
 0x238   :  { %327 = vst [vmem:[%s475_s6] sm:$0xff] %v326_v8   ;;  %v269_v11 = vadd.f32 %v306_v0, %v258_v9 }
 0x23a   :  { %v331_v12 = vpack.c.bf16 %v269_v11, %v268_v10 }
 0x23c   :  { %334 = vst [vmem:[%s475_s6 + $0x8] sm:$0xff] %v331_v12  }

// kernel: bert_ner_forward.14
= control target key start
LH: loop header
LB: loop body
LE: loop exit
PB: predicated region body
PF: predicated region fallthrough
CT: control target
= control target key end

     0   :  { %s1431_s15 = smov 0   ;;  %s1433_s16 = smov 0   ;;  %s1617_s0 = inlined_call_operand.vmem [shape: bf16[2,16,384], index: 0, kind: input, shape index: {}, may-alias: {0,1,2}]   ;;  %s1618_s1 = inlined_call_operand.vmem [shape: bf16[2,16,384], index: 1, kind: input, shape index: {}, may-alias: {0,1,2}]   ;;  %s1619_s2 = inlined_call_operand.vmem [shape: bf16[2,16,384], index: 2, kind: input, shape index: {}, may-alias: {0,1,2}]   ;;  %s1620_s3 = inlined_call_operand.vmem [shape: f32[2,1,16], index: 3, kind: input, shape index: {}]   ;;  %s1621_s4 = inlined_call_operand.vmem [shape: bf16[2,16,128], index: 4, kind: output, shape index: {}]  }
   0x1   :  { %s1435_s17 = smov 0   ;;  %s1437_s18 = smov 0  }
   0x2   :  { %s1439_s19 = smov 0  }
   0x3 LB: > { %s33_s20 = sadd.s32 1, %s1395_s18  ;;  %p51_p1 = scmp.ne.s32.totalorder %s1387_s16, %s1383_s15  ;;  %s1399_s19 = sphi %s1439_s19, %s14_s19   ;;  %s1395_s18 = sphi %s1437_s18, %s1626_s18   ;;  %s1391_s17 = sphi %s1435_s17, %s1625_s17   ;;  %s1387_s16 = sphi %s1433_s16, %s1624_s16   ;;  %s1383_s15 = sphi %s1431_s15, %s1623_s15  }
   0x4   : > { %p35_p0 = scmp.ge.s32.totalorder %s33_s20, 2  ;;  %p52_p2 = scmp.eq.s32.totalorder %s1399_s19, 0 }
   0x5   : > { %s44_s23 = sadd.s32 1, %s1387_s16  ;;  %p1160_p5 = scmp.ge.s32.totalorder %s1399_s19, 2 }
   0x6   : > { %s1628_s20 = smov (%p35_p0, %s33_s20), 0  ;;  %p1462_p3 = por %p52_p2, %p51_p1 }
   0x7   : > { %s37_s22 = ssub.s32 %s1395_s18, %s1628_s20  ;;  %193 = sbr.rel (%p1160_p5) target bundleno = 35 (0x23), region = 16 }
   0x8   : > { %p42_p4 = scmp.eq.s32.totalorder %s37_s22, 0 }
   0xa   : > { %s1470_s24 = scalar_select %p42_p4, %s1387_s16, %s44_s23  }
   0xe   : > { %196 = sbr.rel (!%p1462_p3) target bundleno = 21 (0x15), region = 20  ;;  %s198_s25 = sand.u32 (%p1462_p3), 1, %s1387_s16  }
   0xf   : > { %s1265_s26 = smul.u32 (%p1462_p3), 24, %s1395_s18  ;;  %s1161_s27 = sshll.u32 (%p1462_p3), %s198_s25, 3 }
  0x10   : > { %s200_s5 = scalar_lea.vmem (%p1462_p3), [#allocation2], %s1161_s27 }
  0x11   : > { %s207_s30 = scalar_lea.vmem (%p1462_p3), %s1617_s0, %s1265_s26 }
  0x12   : > { %v223_v0 = vld [vmem:[%s207_s30] sm:$0xf] (%p1462_p3)  ;;  %v225_v1 = vld [vmem:[%s207_s30 + $0xc] sm:$0xf] (%p1462_p3) }
  0x13   : > { %224 = vst [vmem:[%s200_s5] sm:$0xf] (%p1462_p3), %v223_v0  ;;  %226 = vst [vmem:[%s200_s5 + $0x4] sm:$0xf] (%p1462_p3), %v225_v1 }
  0x15 PF: > { %253 = sbr.rel (!%p1462_p3) target bundleno = 28 (0x1c), region = 61  ;;  %s255_s6 = sand.u32 (%p1462_p3), 1, %s1387_s16  }
  0x16   : > { %s1164_s7 = smul.u32 (%p1462_p3), 24, %s1395_s18  ;;  %s1163_s8 = sshll.u32 (%p1462_p3), %s255_s6, 3 }
  0x17   : > { %s257_s12 = scalar_lea.vmem (%p1462_p3), [#allocation3], %s1163_s8 }
  0x18   : > { %s1051_s11 = scalar_lea.vmem (%p1462_p3), %s1618_s1, %s1164_s7 }
  0x19   : > { %v1165_v2 = vld [vmem:[%s1051_s11 + $0x4] sm:$0xf] (%p1462_p3)  ;;  %v1166_v3 = vld [vmem:[%s1051_s11 + $0x10] sm:$0xf] (%p1462_p3) }
  0x1a   : > { %279 = vst [vmem:[%s257_s12] sm:$0xf] (%p1462_p3), %v1165_v2  ;;  %281 = vst [vmem:[%s257_s12 + $0x4] sm:$0xf] (%p1462_p3), %v1166_v3 }
  0x1c PF: > { %308 = sbr.rel (!%p1462_p3) target bundleno = 35 (0x23), region = 102  ;;  %s310_s13 = sand.u32 (%p1462_p3), 1, %s1387_s16  }
  0x1d   : > { %s1168_s14 = smul.u32 (%p1462_p3), 24, %s1395_s18  ;;  %s1167_s22 = sshll.u32 (%p1462_p3), %s310_s13, 3 }
  0x1e   : > { %s312_s27 = scalar_lea.vmem (%p1462_p3), [#allocation4], %s1167_s22 }
  0x1f   : > { %s1058_s26 = scalar_lea.vmem (%p1462_p3), %s1619_s2, %s1168_s14 }
  0x20   : > { %v1169_v4 = vld [vmem:[%s1058_s26 + $0x8] sm:$0xf] (%p1462_p3)  ;;  %v1170_v5 = vld [vmem:[%s1058_s26 + $0x14] sm:$0xf] (%p1462_p3) }
  0x21   : > { %334 = vst [vmem:[%s312_s27] sm:$0xf] (%p1462_p3), %v1169_v4  ;;  %336 = vst [vmem:[%s312_s27 + $0x4] sm:$0xf] (%p1462_p3), %v1170_v5 }
  0x23 PF: > { %p1171_p6 = scmp.ge.s32.totalorder %s1399_s19, 1  ;;  %p368_p7 = scmp.lt.s32.totalorder %s1399_s19, 3 }
  0x25   : > { %p369_p8 = pnand %p1171_p6, %p368_p7 }
  0x26   : > { %s375_s21 = sand.u32 (!%p369_p8), 1, %s1383_s15   ;;  %v1401_v6 = vmov (!%p369_p8), 0.0   ;;  %vm1402_vm0 = vmmov (!%p369_p8), 0   ;;  %vm475_vm1 = vcmask (!%p369_p8), 261120   ;;  %p435_p9 = scmp.lt.s32.totalorder (!%p369_p8), %s1391_s17, 1  ;;  %vm523_vm2 = vcmask (!%p369_p8), 130048  }
  0x27   : > { %372 = sbr.rel (%p369_p8) target bundleno = 1524 (0x5f4), region = 147  ;;  %1217 = vmatprep.subr.bf16.mxu0 (!%p369_p8), %v1401_v6  ;;  %s1498_s28 = sshll.u32 (!%p369_p8), %s375_s21, 3  ;;  %1219 = vmatprep.mubr.msk.bf16.mxu0 (!%p369_p8), %vm1402_vm0, %v1401_v6  ;;  %vm986_vm3 = vcmask (!%p369_p8), 523264   ;;  %vm989_vm4 = vcmask (!%p369_p8), 785408  }
  0x28   : > { %1223 = vmatprep.subr.bf16.mxu1 (!%p369_p8), %v1401_v6  ;;  %1225 = vmatprep.mubr.msk.bf16.mxu1 (!%p369_p8), %vm1402_vm0, %v1401_v6  ;;  %s384_s15 = scalar_lea.vmem (!%p369_p8), [#allocation3], %s1498_s28  ;;  %s377_s29 = scalar_lea.vmem (!%p369_p8), [#allocation2], %s1498_s28 }
  0x29   : > { %v1326_v7 = vld [vmem:[%s384_s15] sm:$0xff] (!%p369_p8)   ;;  %v1327_v9 = vld [vmem:[%s377_s29] sm:$0xff] (!%p369_p8)   ;;  %s1403_s7 = smov (!%p369_p8), 96   ;;  %s1404_s8 = smov (!%p369_p8), 32  }
  0x2a   : > { %v480_v8 = vsel (!%p369_p8), %vm475_vm1, %v1326_v7, 0  ;;  %s391_s9 = scalar_lea.vmem (!%p369_p8), [#allocation4], %s1498_s28  ;;  %s1405_s10 = smov (!%p369_p8), 64  }
  0x2b   : > { %1218 = vmatpush3.bf16.xpose.msra.mxu0 (!%p369_p8), %v480_v8  ;;  %v1531_v29 = vld [vmem:[%s391_s9] sm:$0xff] (!%p369_p8)  }
  0x2c   : > { %1235 = vmatprep.subr.bf16.mxu0 (!%p369_p8), %v1401_v6  ;;  %1224 = vmatpush3.bf16.msra.mxu1 (!%p369_p8), %v1531_v29 }
  0x2d   : > { %1229 = vmatprep.subr.bf16.mxu1 (!%p369_p8), %v1401_v6 }
  0x2e   : > { %s1630_s17 = smov (!%p435_p9, %s1391_s17), 1 }
  0x2f   : > { %s437_s6 = scalar_lea.vmem %s1620_s3, %s1630_s17  ;;  %s1193_s11 = sshll.u32 %s1630_s17, 3 }
  0x30   : > { %v1520_v10 = vld [vmem:[%s437_s6] ss:$0 sm:$0xff]  ;;  %s449_s14 = scalar_lea.vmem %s1621_s4, %s1193_s11 }
  0x32   : > { %1220 = vmatmul.mubr.msk.bf16.vlgmr.msra.gmra.mrb[0].mxu0 %vm475_vm1, %v1327_v9 }
  0x33   : > { %1237 = vmatprep.mubr.msk.bf16.mxu0 %vm1402_vm0, %v1401_v6 }
 0x105   : > { %v516_v11 = vpop.f32.mrb[0].mxu0 }
 0x106   : > { %v517_v12 = vadd.f32 %v1520_v10, %v516_v11  ;;  %v1221_v13 = vpop.f32.mrb[1].mxu0 }
 0x107   : > { %v519_v14 = vpop.f32.mrb[2].mxu0 }
 0x108   : > { %v520_v15 = vadd.f32 %v1520_v10, %v519_v14  ;;  %v1222_v16 = vpop.f32.mrb[3].mxu0  ;;  %v524_v17 = vsel %vm523_vm2, %v517_v12, -inf }
 0x109   : > { %525 = vmax.xlane.f32.xlu0 %v524_v17 }
 0x10a   : > { %v527_v18 = vsel %vm523_vm2, %v520_v15, -inf }
 0x10d   : > { %528 = vmax.xlane.f32.xlu0 %v527_v18 }
 0x123   : > { %599 = vrot.lane.b32.xlu0 %v1326_v7, %s1403_s7 }
 0x127   : > { %841 = vrot.lane.b32.xlu0 %v1326_v7, %s1404_s8 }
 0x196   : > { %v526_v19 = vpop.xlane.xlu0 %525 }
 0x197   : > { %v530_v20 = vsub.f32 %v517_v12, %v526_v19 }
 0x199   : > { %v532_v21 = vmul.f32 1.442695, %v530_v20 }
 0x19a   : > { %v529_v22 = vpop.xlane.xlu0 %528 }
 0x19b   : > { %1329 = vpow2.f32 %v532_v21  ;;  %v531_v23 = vsub.f32 %v520_v15, %v529_v22 }
 0x19d   : > { %v534_v24 = vmul.f32 1.442695, %v531_v23 }
 0x19e   : > { %v600_v34 = vpop.permute.xlu0 %599 }
 0x19f   : > { %1331 = vpow2.f32 %v534_v24  ;;  %v605_v38 = vsel %vm475_vm1, %v600_v34, 0 }
 0x1a2   : > { %v842_v42 = vpop.permute.xlu0 %841 }
 0x1a3   : > { %v847_v44 = vsel %vm475_vm1, %v842_v42, 0 }
 0x1a5   : > { %v1330_v25 = vpop.eup %1329 }
 0x1a6   : > { %v536_v26 = vsel %vm523_vm2, %v1330_v25, 0.0 }
 0x1a7   : > { %537 = vadd.xlane.f32.xlu1 %v536_v26 }
 0x1a9   : > { %v1332_v27 = vpop.eup %1331 }
 0x1aa   : > { %v539_v28 = vsel %vm523_vm2, %v1332_v27, 0.0 }
 0x1ab   : > { %540 = vadd.xlane.f32.xlu1 %v539_v28 }
 0x1bc   : > { %597 = vrot.lane.b32.xlu1 %v1327_v9, %s1403_s7 }
 0x1c0   : > { %720 = vrot.lane.b32.xlu1 %v1326_v7, %s1405_s10 }
 0x1c4   : > { %718 = vrot.lane.b32.xlu1 %v1327_v9, %s1405_s10 }
 0x1c8   : > { %839 = vrot.lane.b32.xlu1 %v1327_v9, %s1404_s8 }
 0x234   : > { %v538_v30 = vpop.xlane.xlu1 %537 }
 0x235   : > { %1333 = vrcp.f32 %v538_v30 }
 0x238   : > { %v541_v31 = vpop.xlane.xlu1 %540 }
 0x239   : > { %1335 = vrcp.f32 %v541_v31 }
 0x23c   : > { %v598_v37 = vpop.permute.xlu1 %597 }
 0x23f   : > { %v1334_v32 = vpop.eup %1333 }
 0x240   : > { %v544_v35 = vmul.f32 %v1334_v32, %v1330_v25  ;;  %v721_v40 = vpop.permute.xlu1 %720 }
 0x241   : > { %v726_v41 = vsel %vm475_vm1, %v721_v40, 0 }
 0x243   : > { %v1336_v33 = vpop.eup %1335 }
 0x244   : > { %v545_v36 = vmul.f32 %v1336_v33, %v1332_v27  ;;  %v719_v43 = vpop.permute.xlu1 %718 }
 0x246   : > { %v546_v39 = vpack.c.bf16 %v545_v36, %v544_v35 }
 0x248   : > { %1226 = vmatmul.mubr.msk.bf16.vlgmr.msra.gmra.mrb[0].mxu1 %vm523_vm2, %v546_v39  ;;  %v840_v45 = vpop.permute.xlu1 %839 }
 0x249   : > { %1230 = vmatpush3.bf16.xpose.msra.mxu1 %v605_v38  ;;  %1231 = vmatprep.mubr.msk.bf16.mxu1 %vm1402_vm0, %v1401_v6 }
 0x24a   : > { %1241 = vmatprep.subr.bf16.mxu1 %v1401_v6 }
 0x250   : > { %1232 = vmatmul.mubr.msk.bf16.vlgmr.msra.gmra.mrb[4].mxu1 %vm475_vm1, %v598_v37 }
 0x251   : > { %1242 = vmatpush3.bf16.xpose.msra.mxu1 %v726_v41  ;;  %1243 = vmatprep.mubr.msk.bf16.mxu1 %vm1402_vm0, %v1401_v6 }
 0x252   : > { %1253 = vmatprep.subr.bf16.mxu1 %v1401_v6 }
 0x258   : > { %1244 = vmatmul.mubr.msk.bf16.vlgmr.msra.gmra.mrb[8].mxu1 %vm475_vm1, %v719_v43 }
 0x259   : > { %1254 = vmatpush3.bf16.xpose.msra.mxu1 %v847_v44  ;;  %1255 = vmatprep.mubr.msk.bf16.mxu1 %vm1402_vm0, %v1401_v6 }
 0x260   : > { %1256 = vmatmul.mubr.msk.bf16.vlgmr.msra.gmra.mrb[12].mxu1 %vm475_vm1, %v840_v45 }
 0x31b   : > { %v1554_v46 = vpop.f32.mrb[0].mxu1 }
 0x31c   : > { %v1227_v47 = vpop.f32.mrb[1].mxu1 }
 0x31d   : > { %v1556_v48 = vpop.f32.mrb[2].mxu1 }
 0x31e   : > { %v1228_v49 = vpop.f32.mrb[3].mxu1 }
 0x323   : > { %v641_v50 = vpop.f32.mrb[4].mxu1 }
 0x324   : > { %v642_v51 = vadd.f32 %v1520_v10, %v641_v50  ;;  %v1233_v52 = vpop.f32.mrb[5].mxu1 }
 0x325   : > { %v644_v53 = vpop.f32.mrb[6].mxu1 }
 0x326   : > { %v645_v54 = vadd.f32 %v1520_v10, %v644_v53  ;;  %v1234_v55 = vpop.f32.mrb[7].mxu1  ;;  %v648_v56 = vsel %vm523_vm2, %v642_v51, -inf }
 0x327   : > { %649 = vmax.xlane.f32.xlu0 %v648_v56 }
 0x328   : > { %v651_v57 = vsel %vm523_vm2, %v645_v54, -inf }
 0x329   : > { %652 = vmax.xlane.f32.xlu1 %v651_v57 }
 0x32b   : > { %v762_v58 = vpop.f32.mrb[8].mxu1 }
 0x32c   : > { %v763_v59 = vadd.f32 %v1520_v10, %v762_v58  ;;  %v1245_v60 = vpop.f32.mrb[9].mxu1 }
 0x32d   : > { %v765_v61 = vpop.f32.mrb[10].mxu1 }
 0x32e   : > { %v766_v62 = vadd.f32 %v1520_v10, %v765_v61  ;;  %v1246_v63 = vpop.f32.mrb[11].mxu1  ;;  %v769_v0 = vsel %vm523_vm2, %v763_v59, -inf }
 0x32f   : > { %770 = vmax.xlane.f32.xlu0 %v769_v0 }
 0x330   : > { %v772_v1 = vsel %vm523_vm2, %v766_v62, -inf }
 0x333   : > { %773 = vmax.xlane.f32.xlu0 %v772_v1  ;;  %v883_v2 = vpop.f32.mrb[12].mxu1 }
 0x334   : > { %v884_v3 = vadd.f32 %v1520_v10, %v883_v2  ;;  %v1257_v4 = vpop.f32.mrb[13].mxu1 }
 0x335   : > { %v886_v5 = vpop.f32.mrb[14].mxu1 }
 0x336   : > { %v887_v7 = vadd.f32 %v1520_v10, %v886_v5  ;;  %v890_v8 = vsel %vm523_vm2, %v884_v3, -inf  ;;  %v1258_v9 = vpop.f32.mrb[15].mxu1 }
 0x337   : > { %891 = vmax.xlane.f32.xlu0 %v890_v8 }
 0x338   : > { %v893_v11 = vsel %vm523_vm2, %v887_v7, -inf }
 0x339   : > { %894 = vmax.xlane.f32.xlu1 %v893_v11 }
 0x3b4   : > { %v650_v12 = vpop.xlane.xlu0 %649 }
 0x3b5   : > { %v654_v13 = vsub.f32 %v642_v51, %v650_v12 }
 0x3b6   : > { %v653_v14 = vpop.xlane.xlu1 %652 }
 0x3b7   : > { %v656_v15 = vmul.f32 1.442695, %v654_v13  ;;  %v655_v16 = vsub.f32 %v645_v54, %v653_v14 }
 0x3b9   : > { %1337 = vpow2.f32 %v656_v15  ;;  %v658_v17 = vmul.f32 1.442695, %v655_v16 }
 0x3bb   : > { %1339 = vpow2.f32 %v658_v17 }
 0x3bc   : > { %v771_v18 = vpop.xlane.xlu0 %770 }
 0x3bd   : > { %v775_v19 = vsub.f32 %v763_v59, %v771_v18 }
 0x3bf   : > { %v777_v20 = vmul.f32 1.442695, %v775_v19 }
 0x3c0   : > { %v774_v21 = vpop.xlane.xlu0 %773 }
 0x3c1   : > { %1341 = vpow2.f32 %v777_v20  ;;  %v776_v10 = vsub.f32 %v766_v62, %v774_v21 }
 0x3c3   : > { %v1338_v22 = vpop.eup %1337  ;;  %v779_v23 = vmul.f32 1.442695, %v776_v10 }
 0x3c4   : > { %v892_v24 = vpop.xlane.xlu0 %891  ;;  %v660_v25 = vsel %vm523_vm2, %v1338_v22, 0.0 }
 0x3c5   : > { %v1340_v26 = vpop.eup %1339  ;;  %1343 = vpow2.f32 %v779_v23  ;;  %v896_v27 = vsub.f32 %v884_v3, %v892_v24  ;;  %661 = vadd.xlane.f32.xlu0 %v660_v25 }
 0x3c6   : > { %v663_v28 = vsel %vm523_vm2, %v1340_v26, 0.0  ;;  %v895_v37 = vpop.xlane.xlu1 %894 }
 0x3c7   : > { %v898_v30 = vmul.f32 1.442695, %v896_v27  ;;  %664 = vadd.xlane.f32.xlu1 %v663_v28  ;;  %v897_v38 = vsub.f32 %v887_v7, %v895_v37 }
 0x3c9   : > { %1345 = vpow2.f32 %v898_v30  ;;  %v900_v39 = vmul.f32 1.442695, %v897_v38 }
 0x3cb   : > { %v1342_v31 = vpop.eup %1341  ;;  %1347 = vpow2.f32 %v900_v39 }
 0x3cc   : > { %v781_v32 = vsel %vm523_vm2, %v1342_v31, 0.0 }
 0x3cd   : > { %782 = vadd.xlane.f32.xlu0 %v781_v32 }
 0x3cf   : > { %v1344_v33 = vpop.eup %1343 }
 0x3d0   : > { %v784_v34 = vsel %vm523_vm2, %v1344_v33, 0.0 }
 0x3d1   : > { %785 = vadd.xlane.f32.xlu1 %v784_v34 }
 0x3d3   : > { %v1346_v35 = vpop.eup %1345 }
 0x3d4   : > { %v902_v36 = vsel %vm523_vm2, %v1346_v35, 0.0 }
 0x3d5   : > { %903 = vadd.xlane.f32.xlu0 %v902_v36  ;;  %v1348_v40 = vpop.eup %1347 }
 0x3d6   : > { %v905_v41 = vsel %vm523_vm2, %v1348_v40, 0.0 }
 0x3e2   : > { %792 = vrot.lane.b32.xlu1 %v1531_v29, %s1405_s10 }
 0x3eb   : > { %671 = vrot.lane.b32.xlu0 %v1531_v29, %s1403_s7 }
 0x406   : > { %906 = vadd.xlane.f32.xlu1 %v905_v41 }
 0x417   : > { %913 = vrot.lane.b32.xlu1 %v1531_v29, %s1404_s8 }
 0x452   : > { %v662_v43 = vpop.xlane.xlu0 %661 }
 0x454   : > { %v665_v42 = vpop.xlane.xlu1 %664 }
 0x455   : > { %1349 = vrcp.f32 %v665_v42 }
 0x456   : > { %1351 = vrcp.f32 %v662_v43 }
 0x45a   : > { %v783_v44 = vpop.xlane.xlu0 %782 }
 0x45e   : > { %v786_v45 = vpop.xlane.xlu1 %785 }
 0x45f   : > { %1353 = vrcp.f32 %v786_v45  ;;  %v1350_v47 = vpop.eup %1349 }
 0x460   : > { %1355 = vrcp.f32 %v783_v44  ;;  %v1352_v50 = vpop.eup %1351  ;;  %v669_v51 = vmul.f32 %v1350_v47, %v1340_v26 }
 0x461   : > { %v668_v52 = vmul.f32 %v1352_v50, %v1338_v22 }
 0x462   : > { %v904_v49 = vpop.xlane.xlu0 %903  ;;  %v793_v29 = vpop.permute.xlu1 %792 }
 0x463   : > { %v670_v54 = vpack.c.bf16 %v669_v51, %v668_v52  ;;  %1357 = vrcp.f32 %v904_v49 }
 0x466   : > { %v672_v53 = vpop.permute.xlu0 %671 }
 0x467   : > { %1236 = vmatpush3.bf16.msra.mxu0 %v672_v53 }
 0x468   : > { %1247 = vmatprep.subr.bf16.mxu0 %v1401_v6 }
 0x469   : > { %v1354_v55 = vpop.eup %1353 }
 0x46a   : > { %1238 = vmatmul.mubr.msk.bf16.vlgmr.msra.gmra.mrb[4].mxu0 %vm523_vm2, %v670_v54  ;;  %v1356_v56 = vpop.eup %1355  ;;  %v790_v57 = vmul.f32 %v1354_v55, %v1344_v33 }
 0x46b   : > { %1248 = vmatpush3.bf16.msra.mxu0 %v793_v29  ;;  %1249 = vmatprep.mubr.msk.bf16.mxu0 %vm1402_vm0, %v1401_v6  ;;  %v789_v58 = vmul.f32 %v1356_v56, %v1342_v31 }
 0x46c   : > { %1259 = vmatprep.subr.bf16.mxu0 %v1401_v6 }
 0x46d   : > { %v791_v59 = vpack.c.bf16 %v790_v57, %v789_v58  ;;  %v1358_v62 = vpop.eup %1357 }
 0x46e   : > { %v910_v0 = vmul.f32 %v1358_v62, %v1346_v35 }
 0x472   : > { %1250 = vmatmul.mubr.msk.bf16.vlgmr.msra.gmra.mrb[8].mxu0 %vm523_vm2, %v791_v59 }
 0x473   : > { %1261 = vmatprep.mubr.msk.bf16.mxu0 %vm1402_vm0, %v1401_v6 }
 0x493   : > { %v907_v60 = vpop.xlane.xlu1 %906 }
 0x494   : > { %1359 = vrcp.f32 %v907_v60 }
 0x497   : > { %v914_v61 = vpop.permute.xlu1 %913 }
 0x498   : > { %1260 = vmatpush3.bf16.msra.mxu0 %v914_v61 }
 0x49e   : > { %v1360_v63 = vpop.eup %1359 }
 0x49f   : > { %v911_v1 = vmul.f32 %v1360_v63, %v1348_v40 }
 0x4a1   : > { %v912_v2 = vpack.c.bf16 %v911_v1, %v910_v0 }
 0x4a3   : > { %1262 = vmatmul.mubr.msk.bf16.vlgmr.msra.gmra.mrb[12].mxu0 %vm523_vm2, %v912_v2 }
 0x53d   : > { %v711_v3 = vpop.f32.mrb[4].mxu0 }
 0x53e   : > { %v1239_v4 = vpop.f32.mrb[5].mxu0 }
 0x53f   : > { %v714_v5 = vpop.f32.mrb[6].mxu0 }
 0x540   : > { %v1311_v7 = vpack.i.bf16 %v714_v5, %v711_v3  ;;  %v1240_v8 = vpop.f32.mrb[7].mxu0 }
 0x542   : > { %1312 = vrot.lane.b32.xlu1 %v1311_v7, %s1404_s8 }
 0x545   : > { %v832_v6 = vpop.f32.mrb[8].mxu0 }
 0x546   : > { %v1251_v9 = vpop.f32.mrb[9].mxu0 }
 0x547   : > { %v835_v11 = vpop.f32.mrb[10].mxu0 }
 0x548   : > { %v1316_v12 = vpack.i.bf16 %v835_v11, %v832_v6  ;;  %v1252_v13 = vpop.f32.mrb[11].mxu0 }
 0x54a   : > { %1317 = vrot.lane.b32.xlu0 %v1316_v12, %s1405_s10 }
 0x576   : > { %v953_v14 = vpop.f32.mrb[12].mxu0 }
 0x577   : > { %v1263_v15 = vpop.f32.mrb[13].mxu0 }
 0x578   : > { %v956_v16 = vpop.f32.mrb[14].mxu0 }
 0x579   : > { %v1321_v17 = vpack.i.bf16 %v956_v16, %v953_v14  ;;  %v1264_v18 = vpop.f32.mrb[15].mxu0 }
 0x57b   : > { %1322 = vrot.lane.b32.xlu1 %v1321_v17, %s1403_s7 }
 0x5b4   : > { %v1313_v19 = vpop.permute.xlu1 %1312 }
 0x5b5   : > { %v1315_v21 = vunpack.i.h.bf16 %v1313_v19  ;;  %v1314_v10 = vunpack.i.l.bf16 %v1313_v19 }
 0x5b7   : > { %v985_v25 = vsel %vm475_vm1, %v1556_v48, %v1315_v21  ;;  %v984_v26 = vsel %vm475_vm1, %v1554_v46, %v1314_v10 }
 0x5bc   : > { %v1318_v20 = vpop.permute.xlu0 %1317 }
 0x5bd   : > { %v1320_v22 = vunpack.i.h.bf16 %v1318_v20  ;;  %v1319_v23 = vunpack.i.l.bf16 %v1318_v20 }
 0x5bf   : > { %v988_v30 = vsel %vm986_vm3, %v985_v25, %v1320_v22  ;;  %v987_v31 = vsel %vm986_vm3, %v984_v26, %v1319_v23 }
 0x5ed   : > { %v1323_v24 = vpop.permute.xlu1 %1322 }
 0x5ee   : > { %v1325_v27 = vunpack.i.h.bf16 %v1323_v24  ;;  %v1324_v28 = vunpack.i.l.bf16 %v1323_v24 }
 0x5f0   : > { %v991_v32 = vsel %vm989_vm4, %v988_v30, %v1325_v27  ;;  %v990_v33 = vsel %vm989_vm4, %v987_v31, %v1324_v28 }
 0x5f1   : > { %v1199_v34 = vpack.c.bf16 %v991_v32, %v990_v33 }
 0x5f3   : > { %1200 = vst [vmem:[%s449_s14] sm:$0xff] %v1199_v34  }
 0x5f4 PF: > { %s14_s19 = sadd.s32 1, %s1399_s19   ;;  %s1623_s15 = smov %s1387_s16 }
 0x5f5   : > { %p11_p10 = scmp.ge.s32.totalorder %s14_s19, 4   ;;  %s1624_s16 = smov %s1470_s24 }
 0x5f6   : > { %s1625_s17 = smov %s1395_s18  ;;  %s1626_s18 = smov %s1628_s20 }
 0x5f7   :  { %13 = sbr.rel (!%p11_p10) target bundleno = 3 (0x3), region = 213 }

// kernel: bert_ner_forward.13
= control target key start
LH: loop header
LB: loop body
LE: loop exit
PB: predicated region body
PF: predicated region fallthrough
CT: control target
= control target key end

     0   :  { %v548_v1 = vmov 0   ;;  %v362_v27 = vlaneseq  ;;  %s674_s1 = inlined_call_operand.vmem [shape: bf16[128,384], index: 1, kind: input, shape index: {}]   ;;  %s675_s0 = inlined_call_operand.vmem [shape: bf16[32,128], index: 0, kind: input, shape index: {}]   ;;  %s676_s2 = inlined_call_operand.vmem [shape: f32[1,384], index: 2, kind: input, shape index: {}]   ;;  %s677_s3 = inlined_call_operand.vmem [shape: bf16[32,384], index: 3, kind: output, shape index: {}]  }
   0x1   :  { %v514_v0 = vld [vmem:[%s674_s1 + $0x4] ss:$12 sps:$4 sm:$0xff]   ;;  %251 = vmatprep.mubr.bf16.mxu0 %v548_v1  ;;  %v516_v2 = vld [vmem:[%s674_s1] ss:$12 sps:$4 sm:$0xff]   ;;  %v517_v3 = vld [vmem:[%s674_s1 + $0x1c] ss:$12 sps:$4 sm:$0xff]  }
   0x2   :  { %219 = vmatprep.subr.bf16.mxu0 %v514_v0  ;;  %v519_v4 = vld [vmem:[%s674_s1 + $0x18] ss:$12 sps:$4 sm:$0xff]   ;;  %v520_v5 = vld [vmem:[%s674_s1 + $0x8] ss:$12 sps:$4 sm:$0xff]   ;;  %v524_v7 = vld [vmem:[%s674_s1 + $0x20] ss:$12 sps:$4 sm:$0xff]  }
   0x3   :  { %220 = vmatpush1.bf16.msra.mxu0 %v516_v2  ;;  %v521_v6 = vld [vmem:[%s674_s1 + $0x34] ss:$12 sps:$4 sm:$0xff]   ;;  %493 = vmatprep.subr.bf16.mxu1 %v520_v5  ;;  %v523_v8 = vld [vmem:[%s674_s1 + $0x30] ss:$12 sps:$4 sm:$0xff]   ;;  %v525_v9 = vld [vmem:[%s674_s1 + $0x4c] ss:$12 sps:$4 sm:$0xff]  }
   0x4   :  { %221 = vmatprep.subr.bf16.mxu0 %v517_v3  ;;  %494 = vmatpush3.bf16.msra.mxu1 %v520_v5  ;;  %v528_v10 = vld [vmem:[%s674_s1 + $0x38] ss:$12 sps:$4 sm:$0xff]   ;;  %v527_v11 = vld [vmem:[%s674_s1 + $0x48] ss:$12 sps:$4 sm:$0xff]   ;;  %v532_v12 = vld [vmem:[%s674_s1 + $0x50] ss:$12 sps:$4 sm:$0xff]  }
   0x5   :  { %495 = vmatprep.subr.bf16.mxu1 %v524_v7  ;;  %v529_v13 = vld [vmem:[%s674_s1 + $0x64] ss:$12 sps:$4 sm:$0xff]   ;;  %v531_v14 = vld [vmem:[%s674_s1 + $0x60] ss:$12 sps:$4 sm:$0xff]   ;;  %v536_v15 = vld [vmem:[%s674_s1 + $0x68] ss:$12 sps:$4 sm:$0xff]  }
   0x6   :  { %v533_v16 = vld [vmem:[%s674_s1 + $0x7c] ss:$12 sps:$4 sm:$0xff]   ;;  %v535_v17 = vld [vmem:[%s674_s1 + $0x78] ss:$12 sps:$4 sm:$0xff]   ;;  %v540_v19 = vld [vmem:[%s674_s1 + $0x80] ss:$12 sps:$4 sm:$0xff]  }
   0x7   :  { %222 = vmatpush1.bf16.msra.mxu0 %v519_v4  ;;  %v545_v18 = vld [vmem:[%s675_s0] sm:$0xff]   ;;  %v539_v21 = vld [vmem:[%s674_s1 + $0x90] ss:$12 sps:$4 sm:$0xff]   ;;  %v541_v23 = vld [vmem:[%s674_s1 + $0xac] ss:$12 sps:$4 sm:$0xff]   ;;  %v363_v28 = vshrl.u32 %v362_v27, 7 }
   0x8   :  { %223 = vmatprep.subr.bf16.mxu0 %v521_v6  ;;  %496 = vmatpush3.bf16.msra.mxu1 %v524_v7  ;;  %v537_v20 = vld [vmem:[%s674_s1 + $0x94] ss:$12 sps:$4 sm:$0xff]   ;;  %v544_v22 = vld [vmem:[%s674_s1 + $0x98] ss:$12 sps:$4 sm:$0xff]   ;;  %v546_v25 = vld [vmem:[%s674_s1 + $0xb0] ss:$12 sps:$4 sm:$0xff]  }
   0x9   :  { %497 = vmatprep.subr.bf16.mxu1 %v528_v10  ;;  %509 = vmatprep.mubr.bf16.mxu1 %v545_v18  ;;  %v543_v24 = vld [vmem:[%s674_s1 + $0xa8] ss:$12 sps:$4 sm:$0xff]   ;;  %v364_v29 = vsub.s32 0, %v363_v28  ;;  %v360_v30 = vld [vmem:[%s676_s2] sm:$0x7]  ;;  %v368_v31 = vsub.s32 1, %v363_v28 }
   0xa   :  { %v547_v26 = vld [vmem:[%s675_s0 + $0x8] sm:$0xff]   ;;  %v372_v32 = vsub.s32 2, %v363_v28 }
   0xb   :  { %224 = vmatpush1.bf16.msra.mxu0 %v523_v8  ;;  %v365_v33 = vrot.slane %v360_v30, %v364_v29  ;;  %v369_v34 = vrot.slane %v360_v30, %v368_v31 }
   0xc   :  { %225 = vmatprep.subr.bf16.mxu0 %v525_v9  ;;  %498 = vmatpush3.bf16.msra.mxu1 %v528_v10  ;;  %v373_v36 = vrot.slane %v360_v30, %v372_v32 }
   0xd   :  { %499 = vmatprep.subr.bf16.mxu1 %v532_v12 }
   0xf   :  { %226 = vmatpush1.bf16.msra.mxu0 %v527_v11 }
  0x10   :  { %227 = vmatprep.subr.bf16.mxu0 %v529_v13  ;;  %500 = vmatpush3.bf16.msra.mxu1 %v532_v12 }
  0x11   :  { %501 = vmatprep.subr.bf16.mxu1 %v536_v15 }
  0x13   :  { %228 = vmatpush1.bf16.msra.mxu0 %v531_v14 }
  0x14   :  { %229 = vmatprep.subr.bf16.mxu0 %v533_v16  ;;  %502 = vmatpush3.bf16.msra.mxu1 %v536_v15 }
  0x15   :  { %503 = vmatprep.subr.bf16.mxu1 %v540_v19 }
  0x17   :  { %230 = vmatpush1.bf16.msra.mxu0 %v535_v17 }
  0x18   :  { %231 = vmatprep.subr.bf16.mxu0 %v537_v20  ;;  %504 = vmatpush3.bf16.msra.mxu1 %v540_v19 }
  0x19   :  { %505 = vmatprep.subr.bf16.mxu1 %v544_v22 }
  0x1b   :  { %232 = vmatpush1.bf16.msra.mxu0 %v539_v21 }
  0x1c   :  { %233 = vmatprep.subr.bf16.mxu0 %v541_v23  ;;  %506 = vmatpush3.bf16.msra.mxu1 %v544_v22 }
  0x1d   :  { %507 = vmatprep.subr.bf16.mxu1 %v546_v25 }
  0x1f   :  { %234 = vmatpush1.bf16.msra.mxu0 %v543_v24 }
  0x20   :  { %508 = vmatpush3.bf16.msra.mxu1 %v546_v25 }
  0x22   :  { %252 = vmatmul.mubr.bf16.vlgmr.msra.gmra.mrb[0].mxu0 %v545_v18 }
  0x23   :  { %261 = vmatprep.mubr.bf16.mxu0 %v548_v1  ;;  %510 = vmatmul.mubr.bf16.vlgmr.msra.gmra.mrb[0].mxu1 %v547_v26 }
  0x2a   :  { %262 = vmatmul.mubr.bf16.gmra.mrb[4].mxu0 %v547_v26 }
  0xf5   :  { %v253_v35 = vpop.f32.mrb[0].mxu0 }
  0xf6   :  { %v377_v37 = vadd.f32 %v365_v33, %v253_v35  ;;  %v255_v38 = vpop.f32.mrb[1].mxu0  ;;  %v511_v43 = vpop.f32.mrb[0].mxu1 }
  0xf7   :  { %v378_v39 = vadd.f32 %v369_v34, %v255_v38  ;;  %v257_v40 = vpop.f32.mrb[2].mxu0  ;;  %v385_v46 = vadd.f32 %v511_v43, %v373_v36  ;;  %v306_v47 = vpop.f32.mrb[1].mxu1 }
  0xf8   :  { %v380_v41 = vadd.f32 %v365_v33, %v257_v40  ;;  %v259_v42 = vpop.f32.mrb[3].mxu0  ;;  %v379_v48 = vadd.f32 %v373_v36, %v306_v47  ;;  %v512_v49 = vpop.f32.mrb[2].mxu1 }
  0xf9   :  { %v475_v44 = vpack.c.bf16 %v378_v39, %v377_v37  ;;  %v381_v45 = vadd.f32 %v369_v34, %v259_v42  ;;  %v480_v51 = vpack.c.bf16 %v385_v46, %v385_v46  ;;  %v388_v52 = vadd.f32 %v512_v49, %v373_v36  ;;  %v309_v53 = vpop.f32.mrb[3].mxu1 }
  0xfa   :  { %v476_v54 = vpack.c.bf16 %v379_v48, %v379_v48  ;;  %v382_v55 = vadd.f32 %v373_v36, %v309_v53 }
  0xfb   :  { %429 = vst [vmem:[%s677_s3] sm:$0xff] %v475_v44  ;;  %v477_v50 = vpack.c.bf16 %v381_v45, %v380_v41  ;;  %434 = vst [vmem:[%s677_s3 + $0x20] sm:$0xf] %v480_v51  ;;  %v482_v56 = vpack.c.bf16 %v388_v52, %v388_v52 }
  0xfc   :  { %430 = vst [vmem:[%s677_s3 + $0x8] sm:$0xf] %v476_v54  ;;  %v478_v59 = vpack.c.bf16 %v382_v55, %v382_v55 }
  0xfd   :  { %431 = vst [vmem:[%s677_s3 + $0xc] sm:$0xff] %v477_v50  ;;  %v263_v57 = vpop.f32.mrb[4].mxu0  ;;  %436 = vst [vmem:[%s677_s3 + $0x2c] sm:$0xf] %v482_v56 }
  0xfe   :  { %v383_v58 = vadd.f32 %v365_v33, %v263_v57  ;;  %v265_v60 = vpop.f32.mrb[5].mxu0  ;;  %432 = vst [vmem:[%s677_s3 + $0x14] sm:$0xf] %v478_v59 }
  0xff   :  { %v384_v61 = vadd.f32 %v369_v34, %v265_v60  ;;  %v267_v62 = vpop.f32.mrb[6].mxu0 }
 0x100   :  { %v386_v63 = vadd.f32 %v365_v33, %v267_v62  ;;  %v269_v0 = vpop.f32.mrb[7].mxu0 }
 0x101   :  { %v479_v1 = vpack.c.bf16 %v384_v61, %v383_v58  ;;  %v387_v2 = vadd.f32 %v369_v34, %v269_v0 }
 0x103   :  { %433 = vst [vmem:[%s677_s3 + $0x18] sm:$0xff] %v479_v1  ;;  %v481_v3 = vpack.c.bf16 %v387_v2, %v386_v63 }
 0x105   :  { %435 = vst [vmem:[%s677_s3 + $0x24] sm:$0xff] %v481_v3 }

// kernel: bert_ner_forward.23
= control target key start
LH: loop header
LB: loop body
LE: loop exit
PB: predicated region body
PF: predicated region fallthrough
CT: control target
= control target key end

     0   :  { %v229_v1 = vmov 0.0   ;;  %vm230_vm0 = vmmov 0   ;;  %s294_s0 = inlined_call_operand.vmem [shape: bf16[2,128], index: 0, kind: input, shape index: {}]   ;;  %s295_s1 = inlined_call_operand.vmem [shape: bf16[128,128], index: 1, kind: input, shape index: {}]   ;;  %s296_s2 = inlined_call_operand.vmem [shape: f32[1,128], index: 2, kind: input, shape index: {}]   ;;  %s297_s3 = inlined_call_operand.hbm [shape: f32[2,128], index: 3, kind: output, shape index: {}]  }
   0x1   :  { %v197_v0 = vld [vmem:[%s295_s1] sm:$0xff]   ;;  %174 = vmatprep.subr.bf16.mxu0 %v229_v1  ;;  %20 = vst [vmem:[#allocation2] sm:$0x3] %v229_v1  ;;  %v198_v2 = vld [vmem:[%s295_s1 + $0x8] sm:$0xff]   ;;  %190 = vmatprep.mubr.msk.bf16.mxu0 %vm230_vm0, %v229_v1  ;;  %v199_v3 = vld [vmem:[%s295_s1 + $0x10] sm:$0xff]  }
   0x2   :  { %175 = vmatpush3.bf16.msra.mxu0 %v197_v0 }
   0x3   :  { %176 = vmatprep.subr.bf16.mxu0 %v229_v1 }
   0x6   :  { %177 = vmatpush3.bf16.msra.mxu0 %v198_v2 }
   0x7   :  { %178 = vmatprep.subr.bf16.mxu0 %v229_v1 }
   0x8   :  { %8 = vsyncpa [#allocation4], 0  ;;  %v200_v4 = vld [vmem:[%s295_s1 + $0x18] sm:$0xff]   ;;  %v201_v5 = vld [vmem:[%s295_s1 + $0x20] sm:$0xff]   ;;  %s231_s5 = smov [#allocation3]  }
   0x9   :  { %v202_v6 = vld [vmem:[%s295_s1 + $0x28] sm:$0xff]   ;;  %v203_v7 = vld [vmem:[%s295_s1 + $0x30] sm:$0xff]   ;;  %v204_v8 = vld [vmem:[%s295_s1 + $0x38] sm:$0xff]   ;;  %s148_s1 = sshll.u32 %s231_s5, 4  ;;  %s149_s1 = int_to_ptr.vmem [resolvable:$true] %s148_s1 }
   0xa   :  { %179 = vmatpush3.bf16.msra.mxu0 %v199_v3  ;;  %v22_v9 = vld [vmem:[%s294_s0] sm:$0x1]  ;;  %s205_s6 = scalar_lea.vmem %s149_s1, 32  ;;  %p210_p1 = scmp.lt.s32.totalorder %s149_s1, %s149_s1 }
   0xb   :  { %180 = vmatprep.subr.bf16.mxu0 %v229_v1  ;;  %v21_v10 = vld [vmem:[#allocation2] sm:$0x3]  ;;  %p206_p0 = scmp.ne.s32.totalorder %s149_s1, %s205_s6  ;;  %p211_p2 = scmp.lt.s32.totalorder %s205_s6, %s205_s6 }
   0xc   :  { %v164_v16 = vld [vmem:[%s296_s2] ss:$0 sm:$0xff] }
   0xd   :  { %p212_p3 = por %p211_p2, %p210_p1 }
   0xe   :  { %181 = vmatpush3.bf16.msra.mxu0 %v200_v4 }
   0xf   :  { %182 = vmatprep.subr.bf16.mxu0 %v229_v1  ;;  %p213_p4 = pnand %p212_p3, %p206_p0 }
  0x12   :  { %183 = vmatpush3.bf16.msra.mxu0 %v201_v5 }
  0x13   :  { %184 = vmatprep.subr.bf16.mxu0 %v229_v1 }
  0x16   :  { %185 = vmatpush3.bf16.msra.mxu0 %v202_v6 }
  0x17   :  { %186 = vmatprep.subr.bf16.mxu0 %v229_v1 }
  0x1a   :  { %187 = vmatpush3.bf16.msra.mxu0 %v203_v7 }
  0x1b   :  { %188 = vmatprep.subr.bf16.mxu0 %v229_v1 }
  0x1e   :  { %189 = vmatpush3.bf16.msra.mxu0 %v204_v8 }
  0x21   :  { %191 = vmatmul.mubr.bf16.vlgmr.msra.gmra.mrb[0].mxu0 %v22_v9 }
  0xf4   :  { %v121_v11 = vpop.f32.mrb[0].mxu0 }
  0xf5   :  { %v127_v12 = vadd.f32 %v121_v11, %v21_v10  ;;  %v192_v13 = vpop.f32.mrb[1].mxu0 }
  0xf6   :  { %v124_v14 = vpop.f32.mrb[2].mxu0 }
  0xf7   :  { %128 = vst [vmem:[#allocation2] sm:$0x3] %v127_v12  ;;  %v193_v15 = vpop.f32.mrb[3].mxu0 }
  0xfe   :  { %v132_v17 = vld [vmem:[#allocation2] sm:$0x3] }
  0xff   :  { %v140_v18 = vadd.f32 %v164_v16, %v132_v17 }
 0x101   :  { %141 = vst [vmem:[#allocation3] sm:$0x3] %v140_v18 }
 0x102   :  { %216 = shalt.err (!%p213_p4)
}
 0x103   :  { %s217_s8 = scalar_lea.hbm %s297_s3, 32 }
 0x104   :  { %p218_p5 = scmp.ne.s32.totalorder %s297_s3, %s217_s8  ;;  %p221_p6 = scmp.lt.u32.totalorder %s217_s8, %s297_s3 }
 0x106   :  { %p223_p7 = pnand %p221_p6, %p218_p5 }
 0x108   :  { %226 = shalt.err (!%p223_p7)
}
 0x109   :  { %151 = dma.vmem_to_hbm [thread:$0]  %s149_s1, 32, %s297_s3, [#allocation4]  }
 0x10a   :  { %227 = dma.done.wait [#allocation4], 32  }
 0x10b   :  { %228 = vsyncadd [#allocation4], 4294967264 }
 0x10c   :  { %155 = vsyncpa [#allocation4], 1 }

// kernel: bert_ner_forward.21
= control target key start
LH: loop header
LB: loop body
LE: loop exit
PB: predicated region body
PF: predicated region fallthrough
CT: control target
= control target key end

     0   :  { %v197_v0 = vmov 0.0   ;;  %vm198_vm0 = vmmov 0   ;;  %s252_s1 = inlined_call_operand.vmem [shape: bf16[128,128], index: 1, kind: input, shape index: {}]   ;;  %s253_s0 = inlined_call_operand.vmem [shape: bf16[2,128], index: 0, kind: input, shape index: {}]   ;;  %s254_s2 = inlined_call_operand.vmem [shape: f32[1,128], index: 2, kind: input, shape index: {}]   ;;  %s255_s3 = inlined_call_operand.vmem [shape: bf16[2,128], index: 3, kind: output, shape index: {}]  }
   0x1   :  { %165 = vmatprep.subr.bf16.mxu0 %v197_v0  ;;  %19 = vst [vmem:[#allocation2] sm:$0x3] %v197_v0  ;;  %v187_v1 = vld [vmem:[%s252_s1] sm:$0xff]   ;;  %181 = vmatprep.mubr.msk.bf16.mxu0 %vm198_vm0, %v197_v0  ;;  %v188_v2 = vld [vmem:[%s252_s1 + $0x8] sm:$0xff]   ;;  %v189_v3 = vld [vmem:[%s252_s1 + $0x10] sm:$0xff]  }
   0x2   :  { %166 = vmatpush3.bf16.msra.mxu0 %v187_v1  ;;  %v190_v4 = vld [vmem:[%s252_s1 + $0x18] sm:$0xff]   ;;  %v191_v5 = vld [vmem:[%s252_s1 + $0x20] sm:$0xff]   ;;  %v192_v6 = vld [vmem:[%s252_s1 + $0x28] sm:$0xff]  }
   0x3   :  { %167 = vmatprep.subr.bf16.mxu0 %v197_v0  ;;  %v193_v7 = vld [vmem:[%s252_s1 + $0x30] sm:$0xff]   ;;  %v194_v8 = vld [vmem:[%s252_s1 + $0x38] sm:$0xff]   ;;  %v21_v9 = vld [vmem:[%s253_s0] sm:$0x1] }
   0x4   :  { %v155_v16 = vld [vmem:[%s254_s2] ss:$0 sm:$0xff] }
   0x6   :  { %168 = vmatpush3.bf16.msra.mxu0 %v188_v2 }
   0x7   :  { %169 = vmatprep.subr.bf16.mxu0 %v197_v0 }
   0x8   :  { %v20_v10 = vld [vmem:[#allocation2] sm:$0x3] }
   0xa   :  { %170 = vmatpush3.bf16.msra.mxu0 %v189_v3 }
   0xb   :  { %171 = vmatprep.subr.bf16.mxu0 %v197_v0 }
   0xe   :  { %172 = vmatpush3.bf16.msra.mxu0 %v190_v4 }
   0xf   :  { %173 = vmatprep.subr.bf16.mxu0 %v197_v0 }
  0x12   :  { %174 = vmatpush3.bf16.msra.mxu0 %v191_v5 }
  0x13   :  { %175 = vmatprep.subr.bf16.mxu0 %v197_v0 }
  0x16   :  { %176 = vmatpush3.bf16.msra.mxu0 %v192_v6 }
  0x17   :  { %177 = vmatprep.subr.bf16.mxu0 %v197_v0 }
  0x1a   :  { %178 = vmatpush3.bf16.msra.mxu0 %v193_v7 }
  0x1b   :  { %179 = vmatprep.subr.bf16.mxu0 %v197_v0 }
  0x1e   :  { %180 = vmatpush3.bf16.msra.mxu0 %v194_v8 }
  0x21   :  { %182 = vmatmul.mubr.bf16.vlgmr.msra.gmra.mrb[0].mxu0 %v21_v9 }
  0xf4   :  { %v120_v11 = vpop.f32.mrb[0].mxu0 }
  0xf5   :  { %v126_v12 = vadd.f32 %v120_v11, %v20_v10  ;;  %v183_v13 = vpop.f32.mrb[1].mxu0 }
  0xf6   :  { %v123_v14 = vpop.f32.mrb[2].mxu0 }
  0xf7   :  { %127 = vst [vmem:[#allocation2] sm:$0x3] %v126_v12  ;;  %v184_v15 = vpop.f32.mrb[3].mxu0 }
  0xfe   :  { %v131_v17 = vld [vmem:[#allocation2] sm:$0x3] }
  0xff   :  { %v139_v18 = vadd.f32 %v155_v16, %v131_v17 }
 0x101   :  { %195 = vtanh.f32 %v139_v18 }
 0x10b   :  { %v196_v19 = vpop.eup %195 }
 0x10c   :  { %v141_v20 = vpack.c.bf16 %v196_v19, %v196_v19 }
 0x10e   :  { %142 = vst [vmem:[%s255_s3] sm:$0x1] %v141_v20 }

// kernel: bert_ner_forward.22
= control target key start
LH: loop header
LB: loop body
LE: loop exit
PB: predicated region body
PF: predicated region fallthrough
CT: control target
= control target key end

     0   :  { %s306_s1 = inlined_call_operand.vmem [shape: bf16[128,128], index: 1, kind: input, shape index: {}]   ;;  %s307_s0 = inlined_call_operand.vmem [shape: bf16[32,128], index: 0, kind: input, shape index: {}]   ;;  %s308_s2 = inlined_call_operand.vmem [shape: f32[1,128], index: 2, kind: input, shape index: {}]   ;;  %s309_s3 = inlined_call_operand.vmem [shape: f32[32,128], index: 3, kind: output, shape index: {}]  }
   0x1   :  { %v231_v0 = vld [vmem:[%s306_s1] sm:$0xff]   ;;  %v232_v1 = vld [vmem:[%s306_s1 + $0x8] sm:$0xff]   ;;  %v233_v2 = vld [vmem:[%s306_s1 + $0x10] sm:$0xff]  }
   0x2   :  { %211 = vmatprep.subr.bf16.mxu0 %v231_v0  ;;  %v234_v3 = vld [vmem:[%s306_s1 + $0x18] sm:$0xff]   ;;  %v239_v4 = vld [vmem:[%s307_s0] sm:$0xff]   ;;  %v236_v6 = vld [vmem:[%s306_s1 + $0x28] sm:$0xff]  }
   0x3   :  { %212 = vmatpush3.bf16.msra.mxu0 %v231_v0  ;;  %227 = vmatprep.mubr.bf16.mxu0 %v239_v4  ;;  %v235_v5 = vld [vmem:[%s306_s1 + $0x20] sm:$0xff]   ;;  %v237_v7 = vld [vmem:[%s306_s1 + $0x30] sm:$0xff]   ;;  %v238_v8 = vld [vmem:[%s306_s1 + $0x38] sm:$0xff]  }
   0x4   :  { %213 = vmatprep.subr.bf16.mxu0 %v232_v1  ;;  %v240_v9 = vld [vmem:[%s307_s0 + $0x8] sm:$0xff]   ;;  %v200_v10 = vld [vmem:[%s308_s2] ss:$0 sm:$0xff] }
   0x7   :  { %214 = vmatpush3.bf16.msra.mxu0 %v232_v1 }
   0x8   :  { %215 = vmatprep.subr.bf16.mxu0 %v233_v2 }
   0xb   :  { %216 = vmatpush3.bf16.msra.mxu0 %v233_v2 }
   0xc   :  { %217 = vmatprep.subr.bf16.mxu0 %v234_v3 }
   0xf   :  { %218 = vmatpush3.bf16.msra.mxu0 %v234_v3 }
  0x10   :  { %219 = vmatprep.subr.bf16.mxu0 %v235_v5 }
  0x13   :  { %220 = vmatpush3.bf16.msra.mxu0 %v235_v5 }
  0x14   :  { %221 = vmatprep.subr.bf16.mxu0 %v236_v6 }
  0x17   :  { %222 = vmatpush3.bf16.msra.mxu0 %v236_v6 }
  0x18   :  { %223 = vmatprep.subr.bf16.mxu0 %v237_v7 }
  0x1b   :  { %224 = vmatpush3.bf16.msra.mxu0 %v237_v7 }
  0x1c   :  { %225 = vmatprep.subr.bf16.mxu0 %v238_v8 }
  0x1f   :  { %226 = vmatpush3.bf16.msra.mxu0 %v238_v8 }
  0x22   :  { %228 = vmatmul.mubr.bf16.vlgmr.msra.gmra.mrb[0].mxu0 %v240_v9 }
  0xf5   :  { %v229_v11 = vpop.f32.mrb[0].mxu0 }
  0xf6   :  { %v180_v12 = vadd.f32 %v229_v11, %v200_v10  ;;  %v141_v13 = vpop.f32.mrb[1].mxu0 }
  0xf7   :  { %v178_v14 = vadd.f32 %v200_v10, %v141_v13  ;;  %v230_v15 = vpop.f32.mrb[2].mxu0 }
  0xf8   :  { %184 = vst [vmem:[%s309_s3 + $0x10] sm:$0xff] %v180_v12  ;;  %v181_v16 = vadd.f32 %v230_v15, %v200_v10  ;;  %v144_v17 = vpop.f32.mrb[3].mxu0 }
  0xf9   :  { %182 = vst [vmem:[%s309_s3] sm:$0xff] %v178_v14  ;;  %v179_v18 = vadd.f32 %v200_v10, %v144_v17 }
  0xfa   :  { %185 = vst [vmem:[%s309_s3 + $0x18] sm:$0xff] %v181_v16 }
  0xfb   :  { %183 = vst [vmem:[%s309_s3 + $0x8] sm:$0xff] %v179_v18 }

// kernel: bert_ner_forward.16
= control target key start
LH: loop header
LB: loop body
LE: loop exit
PB: predicated region body
PF: predicated region fallthrough
CT: control target
= control target key end

     0   :  { %v758_v1 = vmov 0   ;;  %v57_v35 = vlaneseq  ;;  %s981_s1 = inlined_call_operand.vmem [shape: bf16[128,256], index: 1, kind: input, shape index: {}]   ;;  %s982_s0 = inlined_call_operand.vmem [shape: bf16[32,128], index: 0, kind: input, shape index: {}]   ;;  %s983_s3 = inlined_call_operand.vmem [shape: bf16[256,128], index: 3, kind: input, shape index: {}]   ;;  %s984_s2 = inlined_call_operand.vmem [shape: f32[1,256], index: 2, kind: input, shape index: {}]   ;;  %s985_s4 = inlined_call_operand.vmem [shape: f32[1,128], index: 4, kind: input, shape index: {}]   ;;  %s986_s5 = inlined_call_operand.vmem [shape: f32[1,128], index: 5, kind: input, shape index: {}]   ;;  %s987_s6 = inlined_call_operand.vmem [shape: f32[1,128], index: 6, kind: input, shape index: {}]   ;;  %s988_s7 = inlined_call_operand.vmem [shape: bf16[32,128], index: 7, kind: output, shape index: {}]  }
   0x1   :  { %v692_v0 = vld [vmem:[%s981_s1 + $0x4] ss:$8 sps:$4 sm:$0xff]   ;;  %191 = vmatprep.mubr.bf16.mxu0 %v758_v1  ;;  %v694_v2 = vld [vmem:[%s981_s1] ss:$8 sps:$4 sm:$0xff]   ;;  %v695_v3 = vld [vmem:[%s981_s1 + $0x14] ss:$8 sps:$4 sm:$0xff]  }
   0x2   :  { %159 = vmatprep.subr.bf16.mxu0 %v692_v0  ;;  %v697_v4 = vld [vmem:[%s981_s1 + $0x10] ss:$8 sps:$4 sm:$0xff]   ;;  %v698_v5 = vld [vmem:[%s981_s1 + $0x24] ss:$8 sps:$4 sm:$0xff]   ;;  %v700_v6 = vld [vmem:[%s981_s1 + $0x20] ss:$8 sps:$4 sm:$0xff]  }
   0x3   :  { %160 = vmatpush1.bf16.msra.mxu0 %v694_v2  ;;  %v701_v7 = vld [vmem:[%s981_s1 + $0x34] ss:$8 sps:$4 sm:$0xff]   ;;  %v703_v8 = vld [vmem:[%s981_s1 + $0x30] ss:$8 sps:$4 sm:$0xff]   ;;  %v704_v9 = vld [vmem:[%s981_s1 + $0x44] ss:$8 sps:$4 sm:$0xff]  }
   0x4   :  { %161 = vmatprep.subr.bf16.mxu0 %v695_v3  ;;  %v706_v10 = vld [vmem:[%s981_s1 + $0x40] ss:$8 sps:$4 sm:$0xff]   ;;  %v707_v11 = vld [vmem:[%s981_s1 + $0x54] ss:$8 sps:$4 sm:$0xff]   ;;  %v709_v12 = vld [vmem:[%s981_s1 + $0x50] ss:$8 sps:$4 sm:$0xff]  }
   0x5   :  { %v710_v13 = vld [vmem:[%s981_s1 + $0x64] ss:$8 sps:$4 sm:$0xff]   ;;  %v712_v14 = vld [vmem:[%s981_s1 + $0x60] ss:$8 sps:$4 sm:$0xff]   ;;  %v713_v15 = vld [vmem:[%s981_s1 + $0x74] ss:$8 sps:$4 sm:$0xff]  }
   0x6   :  { %v715_v16 = vld [vmem:[%s981_s1 + $0x70] ss:$8 sps:$4 sm:$0xff]   ;;  %v716_v17 = vld [vmem:[%s982_s0] sm:$0xff]   ;;  %v717_v18 = vld [vmem:[%s982_s0 + $0x8] sm:$0xff]   ;;  %v58_v36 = vshrl.u32 %v57_v35, 7 }
   0x7   :  { %162 = vmatpush1.bf16.msra.mxu0 %v697_v4  ;;  %v718_v19 = vld [vmem:[%s983_s3 + $0x40] sm:$0xff]   ;;  %v720_v21 = vld [vmem:[%s983_s3 + $0x48] sm:$0xff]   ;;  %v722_v23 = vld [vmem:[%s983_s3 + $0x50] sm:$0xff]  }
   0x8   :  { %163 = vmatprep.subr.bf16.mxu0 %v698_v5  ;;  %v719_v20 = vld [vmem:[%s983_s3] sm:$0xff]   ;;  %663 = vmatprep.subr.bf16.mxu1 %v718_v19  ;;  %v721_v22 = vld [vmem:[%s983_s3 + $0x8] sm:$0xff]   ;;  %v723_v24 = vld [vmem:[%s983_s3 + $0x10] sm:$0xff]   ;;  %v59_v37 = vsub.s32 0, %v58_v36  ;;  %v63_v39 = vsub.s32 1, %v58_v36 }
   0x9   :  { %664 = vmatpush3.bf16.msra.mxu1 %v719_v20  ;;  %v724_v25 = vld [vmem:[%s983_s3 + $0x58] sm:$0xff]   ;;  %v726_v27 = vld [vmem:[%s983_s3 + $0x60] sm:$0xff]   ;;  %v728_v29 = vld [vmem:[%s983_s3 + $0x68] sm:$0xff]  }
   0xa   :  { %665 = vmatprep.subr.bf16.mxu1 %v720_v21  ;;  %v725_v26 = vld [vmem:[%s983_s3 + $0x18] sm:$0xff]   ;;  %v727_v28 = vld [vmem:[%s983_s3 + $0x20] sm:$0xff]   ;;  %v729_v30 = vld [vmem:[%s983_s3 + $0x28] sm:$0xff]  }
   0xb   :  { %164 = vmatpush1.bf16.msra.mxu0 %v700_v6  ;;  %v730_v31 = vld [vmem:[%s983_s3 + $0x70] sm:$0xff]   ;;  %v732_v33 = vld [vmem:[%s983_s3 + $0x78] sm:$0xff]   ;;  %v55_v38 = vld [vmem:[%s984_s2] sm:$0x3] }
   0xc   :  { %165 = vmatprep.subr.bf16.mxu0 %v701_v7  ;;  %v731_v32 = vld [vmem:[%s983_s3 + $0x30] sm:$0xff]   ;;  %v733_v34 = vld [vmem:[%s983_s3 + $0x38] sm:$0xff]   ;;  %v60_v40 = vrot.slane %v55_v38, %v59_v37  ;;  %v64_v41 = vrot.slane %v55_v38, %v63_v39 }
   0xd   :  { %666 = vmatpush3.bf16.msra.mxu1 %v721_v22 }
   0xe   :  { %667 = vmatprep.subr.bf16.mxu1 %v722_v23 }
   0xf   :  { %166 = vmatpush1.bf16.msra.mxu0 %v703_v8 }
  0x10   :  { %167 = vmatprep.subr.bf16.mxu0 %v704_v9 }
  0x11   :  { %668 = vmatpush3.bf16.msra.mxu1 %v723_v24 }
  0x12   :  { %669 = vmatprep.subr.bf16.mxu1 %v724_v25 }
  0x13   :  { %168 = vmatpush1.bf16.msra.mxu0 %v706_v10 }
  0x14   :  { %169 = vmatprep.subr.bf16.mxu0 %v707_v11 }
  0x15   :  { %670 = vmatpush3.bf16.msra.mxu1 %v725_v26 }
  0x16   :  { %671 = vmatprep.subr.bf16.mxu1 %v726_v27 }
  0x17   :  { %170 = vmatpush1.bf16.msra.mxu0 %v709_v12 }
  0x18   :  { %171 = vmatprep.subr.bf16.mxu0 %v710_v13 }
  0x19   :  { %672 = vmatpush3.bf16.msra.mxu1 %v727_v28 }
  0x1a   :  { %673 = vmatprep.subr.bf16.mxu1 %v728_v29 }
  0x1b   :  { %172 = vmatpush1.bf16.msra.mxu0 %v712_v14 }
  0x1c   :  { %173 = vmatprep.subr.bf16.mxu0 %v713_v15 }
  0x1d   :  { %674 = vmatpush3.bf16.msra.mxu1 %v729_v30 }
  0x1e   :  { %675 = vmatprep.subr.bf16.mxu1 %v730_v31 }
  0x1f   :  { %174 = vmatpush1.bf16.msra.mxu0 %v715_v16 }
  0x21   :  { %676 = vmatpush3.bf16.msra.mxu1 %v731_v32 }
  0x22   :  { %192 = vmatmul.mubr.bf16.vlgmr.msra.gmra.mrb[0].mxu0 %v716_v17  ;;  %677 = vmatprep.subr.bf16.mxu1 %v732_v33 }
  0x23   :  { %201 = vmatprep.mubr.bf16.mxu0 %v758_v1 }
  0x25   :  { %678 = vmatpush3.bf16.msra.mxu1 %v733_v34 }
  0x2a   :  { %202 = vmatmul.mubr.bf16.gmra.mrb[4].mxu0 %v717_v18 }
  0xf5   :  { %v193_v42 = vpop.f32.mrb[0].mxu0 }
  0xf6   :  { %v904_v43 = vadd.f32 %v193_v42, %v60_v40  ;;  %v195_v44 = vpop.f32.mrb[1].mxu0 }
  0xf7   :  { %v906_v45 = vadd.f32 %v195_v44, %v64_v41  ;;  %v197_v46 = vpop.f32.mrb[2].mxu0 }
  0xf8   :  { %v212_v47 = vmul.f32 %v904_v43, %v904_v43  ;;  %v910_v48 = vadd.f32 %v197_v46, %v60_v40  ;;  %v199_v49 = vpop.f32.mrb[3].mxu0 }
  0xf9   :  { %v213_v50 = vmul.f32 %v906_v45, %v906_v45  ;;  %v914_v51 = vadd.f32 %v199_v49, %v64_v41 }
  0xfa   :  { %v220_v52 = vmul.f32 %v212_v47, %v904_v43  ;;  %v214_v53 = vmul.f32 %v910_v48, %v910_v48 }
  0xfb   :  { %v221_v54 = vmul.f32 %v213_v50, %v906_v45  ;;  %v215_v55 = vmul.f32 %v914_v51, %v914_v51 }
  0xfc   :  { %v228_v56 = vmul.f32 0.044715, %v220_v52  ;;  %v222_v57 = vmul.f32 %v214_v53, %v910_v48 }
  0xfd   :  { %v229_v58 = vmul.f32 0.044715, %v221_v54  ;;  %v223_v59 = vmul.f32 %v215_v55, %v914_v51  ;;  %v203_v60 = vpop.f32.mrb[4].mxu0 }
  0xfe   :  { %v236_v61 = vadd.f32 %v228_v56, %v904_v43  ;;  %v230_v62 = vmul.f32 0.044715, %v222_v57  ;;  %v925_v63 = vadd.f32 %v203_v60, %v60_v40  ;;  %v205_v0 = vpop.f32.mrb[5].mxu0 }
  0xff   :  { %v231_v1 = vmul.f32 0.044715, %v223_v59  ;;  %v927_v2 = vadd.f32 %v205_v0, %v64_v41  ;;  %v207_v3 = vpop.f32.mrb[6].mxu0  ;;  %v237_v4 = vadd.f32 %v229_v58, %v906_v45 }
 0x100   :  { %v244_v5 = vmul.f32 0.7978846, %v236_v61  ;;  %v238_v6 = vadd.f32 %v230_v62, %v910_v48  ;;  %v216_v7 = vmul.f32 %v925_v63, %v925_v63  ;;  %v933_v8 = vadd.f32 %v207_v3, %v60_v40  ;;  %v209_v9 = vpop.f32.mrb[7].mxu0 }
 0x101   :  { %v217_v10 = vmul.f32 %v927_v2, %v927_v2  ;;  %v937_v11 = vadd.f32 %v209_v9, %v64_v41  ;;  %v239_v12 = vadd.f32 %v231_v1, %v914_v51  ;;  %v245_v13 = vmul.f32 0.7978846, %v237_v4  ;;  %v644_v9 = vld [vmem:[%s982_s0] sm:$0xff]  }
 0x102   :  { %734 = vtanh.f32 %v244_v5  ;;  %v246_v14 = vmul.f32 0.7978846, %v238_v6  ;;  %v224_v15 = vmul.f32 %v216_v7, %v925_v63  ;;  %v218_v16 = vmul.f32 %v933_v8, %v933_v8 }
 0x103   :  { %v225_v17 = vmul.f32 %v217_v10, %v927_v2  ;;  %v219_v18 = vmul.f32 %v937_v11, %v937_v11  ;;  %v247_v19 = vmul.f32 0.7978846, %v239_v12  ;;  %736 = vtanh.f32 %v245_v13 }
 0x104   :  { %738 = vtanh.f32 %v246_v14  ;;  %v232_v20 = vmul.f32 0.044715, %v224_v15  ;;  %v226_v21 = vmul.f32 %v218_v16, %v933_v8  ;;  %v645_v14 = vunpack.c.l.bf16 %v644_v9 }
 0x105   :  { %v233_v22 = vmul.f32 0.044715, %v225_v17  ;;  %v227_v23 = vmul.f32 %v219_v18, %v937_v11  ;;  %740 = vtanh.f32 %v247_v19  ;;  %v646_v18 = vunpack.c.h.bf16 %v644_v9  ;;  %v661_v19 = vld [vmem:[%s982_s0 + $0x8] sm:$0xff]  }
 0x106   :  { %v240_v24 = vadd.f32 %v232_v20, %v925_v63  ;;  %v234_v25 = vmul.f32 0.044715, %v226_v21 }
 0x107   :  { %v241_v26 = vadd.f32 %v233_v22, %v927_v2  ;;  %v235_v27 = vmul.f32 0.044715, %v227_v23 }
 0x108   :  { %v248_v28 = vmul.f32 0.7978846, %v240_v24  ;;  %v242_v29 = vadd.f32 %v234_v25, %v933_v8  ;;  %v649_v25 = vunpack.c.l.bf16 %v661_v19 }
 0x109   :  { %v249_v30 = vmul.f32 0.7978846, %v241_v26  ;;  %v243_v31 = vadd.f32 %v235_v27, %v937_v11 }
 0x10a   :  { %742 = vtanh.f32 %v248_v28  ;;  %v250_v32 = vmul.f32 0.7978846, %v242_v29 }
 0x10b   :  { %744 = vtanh.f32 %v249_v30  ;;  %v251_v33 = vmul.f32 0.7978846, %v243_v31  ;;  %v650_v31 = vunpack.c.h.bf16 %v661_v19 }
 0x10c   :  { %v735_v34 = vpop.eup %734  ;;  %746 = vtanh.f32 %v250_v32 }
 0x10d   :  { %v737_v35 = vpop.eup %736  ;;  %748 = vtanh.f32 %v251_v33  ;;  %v260_v36 = vadd.f32 1.0, %v735_v34 }
 0x10e   :  { %v739_v37 = vpop.eup %738  ;;  %v261_v38 = vadd.f32 1.0, %v737_v35 }
 0x10f   :  { %v741_v39 = vpop.eup %740  ;;  %v262_v40 = vadd.f32 1.0, %v739_v37  ;;  %v268_v41 = vmul.f32 0.5, %v260_v36 }
 0x110   :  { %v263_v42 = vadd.f32 1.0, %v741_v39  ;;  %v269_v44 = vmul.f32 0.5, %v261_v38 }
 0x111   :  { %v270_v46 = vmul.f32 0.5, %v262_v40  ;;  %v276_v49 = vmul.f32 %v268_v41, %v904_v43 }
 0x112   :  { %v271_v47 = vmul.f32 0.5, %v263_v42  ;;  %v277_v53 = vmul.f32 %v269_v44, %v906_v45 }
 0x113   :  { %v278_v50 = vmul.f32 %v270_v46, %v910_v48 }
 0x114   :  { %v743_v52 = vpop.eup %742  ;;  %v279_v54 = vmul.f32 %v271_v47, %v914_v51 }
 0x115   :  { %v745_v55 = vpop.eup %744  ;;  %v288_v56 = vpack.c.bf16 %v278_v50, %v276_v49  ;;  %v264_v57 = vadd.f32 1.0, %v743_v52 }
 0x116   :  { %v747_v58 = vpop.eup %746  ;;  %v289_v59 = vpack.c.bf16 %v279_v54, %v277_v53  ;;  %v265_v60 = vadd.f32 1.0, %v745_v55 }
 0x117   :  { %v749_v61 = vpop.eup %748  ;;  %v266_v62 = vadd.f32 1.0, %v747_v58  ;;  %v272_v0 = vmul.f32 0.5, %v264_v57 }
 0x118   :  { %452 = vmatprep.mubr.bf16.mxu1 %v289_v59  ;;  %v267_v1 = vadd.f32 1.0, %v749_v61  ;;  %v273_v3 = vmul.f32 0.5, %v265_v60 }
 0x119   :  { %453 = vmatmul.mubr.bf16.vlgmr.msra.gmra.mrb[0].mxu1 %v288_v56  ;;  %v274_v43 = vmul.f32 0.5, %v266_v62  ;;  %v280_v4 = vmul.f32 %v272_v0, %v925_v63  ;;  %v632_v63 = vld [vmem:[%s985_s4] ss:$0 sm:$0xff] }
 0x11a   :  { %v275_v48 = vmul.f32 0.5, %v267_v1  ;;  %v281_v51 = vmul.f32 %v273_v3, %v927_v2 }
 0x11b   :  { %v282_v45 = vmul.f32 %v274_v43, %v933_v8 }
 0x11c   :  { %v283_v5 = vmul.f32 %v275_v48, %v937_v11  ;;  %v633_v48 = vld [vmem:[%s986_s5] ss:$0 sm:$0xff] }
 0x11d   :  { %v290_v6 = vpack.c.bf16 %v282_v45, %v280_v4 }
 0x11e   :  { %v291_v7 = vpack.c.bf16 %v283_v5, %v281_v51  ;;  %v634_v5 = vld [vmem:[%s987_s6] ss:$0 sm:$0xff] }
 0x120   :  { %460 = vmatprep.mubr.bf16.mxu1 %v291_v7 }
 0x121   :  { %461 = vmatmul.mubr.bf16.gmra.mrb[4].mxu1 %v290_v6 }
 0x1ec   :  { %v679_v10 = vpop.f32.mrb[0].mxu1 }
 0x1ed   :  { %v680_v12 = vpop.f32.mrb[1].mxu1 }
 0x1ee   :  { %v681_v13 = vadd.f32 %v680_v12, %v679_v10  ;;  %v682_v8 = vpop.f32.mrb[2].mxu1 }
 0x1ef   :  { %v683_v2 = vpop.f32.mrb[3].mxu1 }
 0x1f0   :  { %v491_v15 = vadd.f32 %v681_v13, %v632_v63  ;;  %v684_v11 = vadd.f32 %v683_v2, %v682_v8 }
 0x1f2   :  { %v492_v16 = vadd.f32 %v684_v11, %v632_v63  ;;  %v503_v17 = vadd.f32 %v645_v14, %v491_v15 }
 0x1f4   :  { %v685_v20 = vpop.f32.mrb[4].mxu1  ;;  %507 = vadd.xlane.f32.xlu0 %v503_v17  ;;  %v504_v24 = vadd.f32 %v646_v18, %v492_v16 }
 0x1f5   :  { %v686_v21 = vpop.f32.mrb[5].mxu1 }
 0x1f6   :  { %v687_v22 = vadd.f32 %v686_v21, %v685_v20  ;;  %v688_v23 = vpop.f32.mrb[6].mxu1 }
 0x1f7   :  { %v689_v26 = vpop.f32.mrb[7].mxu1 }
 0x1f8   :  { %v493_v27 = vadd.f32 %v687_v22, %v632_v63  ;;  %v690_v28 = vadd.f32 %v689_v26, %v688_v23  ;;  %509 = vadd.xlane.f32.xlu0 %v504_v24 }
 0x1fa   :  { %v494_v29 = vadd.f32 %v690_v28, %v632_v63  ;;  %v505_v30 = vadd.f32 %v649_v25, %v493_v27 }
 0x1fc   :  { %511 = vadd.xlane.f32.xlu1 %v505_v30  ;;  %v506_v32 = vadd.f32 %v650_v31, %v494_v29 }
 0x200   :  { %513 = vadd.xlane.f32.xlu1 %v506_v32 }
 0x281   :  { %v508_v33 = vpop.xlane.xlu0 %507 }
 0x282   :  { %v516_v34 = vmul.f32 0.0078125, %v508_v33 }
 0x284   :  { %v520_v35 = vsub.f32 %v503_v17, %v516_v34 }
 0x285   :  { %v510_v36 = vpop.xlane.xlu0 %509 }
 0x286   :  { %v517_v37 = vmul.f32 0.0078125, %v510_v36  ;;  %v524_v38 = vmul.f32 %v520_v35, %v520_v35 }
 0x288   :  { %v521_v39 = vsub.f32 %v504_v24, %v517_v37  ;;  %528 = vadd.xlane.f32.xlu0 %v524_v38 }
 0x289   :  { %v512_v40 = vpop.xlane.xlu1 %511 }
 0x28a   :  { %v518_v41 = vmul.f32 0.0078125, %v512_v40  ;;  %v525_v42 = vmul.f32 %v521_v39, %v521_v39 }
 0x28c   :  { %v522_v44 = vsub.f32 %v505_v30, %v518_v41  ;;  %530 = vadd.xlane.f32.xlu1 %v525_v42 }
 0x28d   :  { %v514_v46 = vpop.xlane.xlu1 %513 }
 0x28e   :  { %v519_v47 = vmul.f32 0.0078125, %v514_v46  ;;  %v526_v49 = vmul.f32 %v522_v44, %v522_v44 }
 0x290   :  { %v523_v50 = vsub.f32 %v506_v32, %v519_v47  ;;  %532 = vadd.xlane.f32.xlu0 %v526_v49 }
 0x292   :  { %v527_v52 = vmul.f32 %v523_v50, %v523_v50 }
 0x294   :  { %534 = vadd.xlane.f32.xlu1 %v527_v52 }
 0x315   :  { %v529_v53 = vpop.xlane.xlu0 %528 }
 0x316   :  { %v536_v54 = vmul.f32 0.0078125, %v529_v53 }
 0x318   :  { %v540_v55 = vadd.f32 1e-12, %v536_v54 }
 0x319   :  { %v531_v56 = vpop.xlane.xlu1 %530 }
 0x31a   :  { %750 = vrsqrt.f32 %v540_v55  ;;  %v537_v57 = vmul.f32 0.0078125, %v531_v56 }
 0x31c   :  { %v541_v58 = vadd.f32 1e-12, %v537_v57 }
 0x31d   :  { %v533_v59 = vpop.xlane.xlu0 %532 }
 0x31e   :  { %752 = vrsqrt.f32 %v541_v58  ;;  %v538_v60 = vmul.f32 0.0078125, %v533_v59 }
 0x320   :  { %v542_v61 = vadd.f32 1e-12, %v538_v60 }
 0x321   :  { %v535_v62 = vpop.xlane.xlu1 %534 }
 0x322   :  { %754 = vrsqrt.f32 %v542_v61  ;;  %v539_v0 = vmul.f32 0.0078125, %v535_v62 }
 0x324   :  { %v751_v1 = vpop.eup %750  ;;  %v543_v3 = vadd.f32 1e-12, %v539_v0 }
 0x325   :  { %v548_v43 = vmul.f32 %v751_v1, %v520_v35 }
 0x326   :  { %756 = vrsqrt.f32 %v543_v3 }
 0x327   :  { %v559_v45 = vmul.f32 %v633_v48, %v548_v43 }
 0x328   :  { %v753_v4 = vpop.eup %752 }
 0x329   :  { %v549_v51 = vmul.f32 %v753_v4, %v521_v39  ;;  %v570_v9 = vadd.f32 %v634_v5, %v559_v45 }
 0x32b   :  { %v560_v6 = vmul.f32 %v633_v48, %v549_v51 }
 0x32c   :  { %v755_v7 = vpop.eup %754 }
 0x32d   :  { %v571_v10 = vadd.f32 %v634_v5, %v560_v6  ;;  %v550_v12 = vmul.f32 %v755_v7, %v522_v44 }
 0x32f   :  { %v654_v63 = vpack.c.bf16 %v571_v10, %v570_v9  ;;  %v561_v8 = vmul.f32 %v633_v48, %v550_v12 }
 0x330   :  { %v757_v13 = vpop.eup %756 }
 0x331   :  { %655 = vst [vmem:[%s988_s7] sm:$0xff] %v654_v63   ;;  %v551_v14 = vmul.f32 %v757_v13, %v523_v50  ;;  %v572_v15 = vadd.f32 %v634_v5, %v561_v8 }
 0x333   :  { %v562_v2 = vmul.f32 %v633_v48, %v551_v14 }
 0x335   :  { %v573_v11 = vadd.f32 %v634_v5, %v562_v2 }
 0x337   :  { %v659_v16 = vpack.c.bf16 %v573_v11, %v572_v15 }
 0x339   :  { %662 = vst [vmem:[%s988_s7 + $0x8] sm:$0xff] %v659_v16  }

</bundles_post_ra>
